<compile_context>
chip_gen: v5e
topology: v5e:2x2
jax: 0.10.0
libtpu: 0.0.40
codegen_flags: <defaults>
</compile_context>

<pallas_src>
import math
import functools

import jax
import jax.numpy as jnp
from jax.experimental import pallas as pl
from jax.experimental.pallas import tpu as pltpu

RELATION_NUM = 4
EMB_SIZE = 32
BATCH = 2
SEQ_LEN = 4
SLAB_LANES = 128         # parameter slab lane width
OUT_LANES = 128          # packed output width (lane-dense store)


def _round8(x):
    return (x + 7) // 8 * 8


def _slab_layout(relation_num, emb_size):
    """Static row offsets of each parameter block inside the single [rows,128] slab."""
    R, E = relation_num, emb_size
    emb_off = 0                                   # [R+1, E]  embedding table (row R = padding_idx, zeros)
    gru_w_off = _round8(emb_off + R + 1)          # [2E, 3E]  W_ih^T ; W_hh^T   (r|z|n gate columns)
    gru_b_off = _round8(gru_w_off + 2 * E)        # [2, 3E]   b_ih ; b_hh
    fc_off = _round8(gru_b_off + 2)               # [1, E+1]  fc_w | fc_b
    attn_w_off = _round8(fc_off + 1)              # [2E, E]   W_q^T ; W_k^T
    attn_b_off = _round8(attn_w_off + 2 * E)      # [2, E]    b_q ; b_k
    krelT_off = _round8(attn_b_off + 2)           # [E, R]    (fc_k(relation_emb))^T  (constant)
    rows = _round8(krelT_off + E)
    return dict(emb=emb_off, gru_w=gru_w_off, gru_b=gru_b_off, fc=fc_off,
                attn_w=attn_w_off, attn_b=attn_b_off, krelT=krelT_off, rows=rows)


# ----------------------------------------------------------------------------
# Fused encoder kernel: one grid step == the full forward pass for the whole batch
# ----------------------------------------------------------------------------
def _encoder_kernel(tok_ref, p_ref, out_ref, *, batch, seq_len, relation_num,
                    emb_size, layout):
    B, S, R, E = batch, seq_len, relation_num, emb_size
    f32 = jnp.float32
    dot = functools.partial(jnp.dot, preferred_element_type=f32)
    L = layout

    # ---- resident parameters: one slab DMA, static row/lane slices ----
    emb_all = p_ref[L['emb']:L['emb'] + R + 1, 0:E]                 # [R+1, E]
    rel_emb = emb_all[0:R, :]                                       # [R, E]
    wihT = p_ref[L['gru_w']:L['gru_w'] + E, 0:3 * E]                # [E, 3E]
    whhT = p_ref[L['gru_w'] + E:L['gru_w'] + 2 * E, 0:3 * E]        # [E, 3E]
    gru_b = p_ref[L['gru_b']:L['gru_b'] + 2, 0:3 * E]               # [2, 3E]
    bih, bhh = gru_b[0:1, :], gru_b[1:2, :]
    bhr, bhz, bhn = bhh[:, 0:E], bhh[:, E:2 * E], bhh[:, 2 * E:3 * E]
    fc_row = p_ref[L['fc']:L['fc'] + 1, 0:E + 1]                    # [1, E+1]
    fcw, fcb = fc_row[:, 0:E], fc_row[:, E:E + 1]
    wqT = p_ref[L['attn_w']:L['attn_w'] + E, 0:E]                   # [E, E]
    wkT = p_ref[L['attn_w'] + E:L['attn_w'] + 2 * E, 0:E]           # [E, E]
    attn_b = p_ref[L['attn_b']:L['attn_b'] + 2, 0:E]                # [2, E]
    bq, bk = attn_b[0:1, :], attn_b[1:2, :]
    k_relT = p_ref[L['krelT']:L['krelT'] + E, 0:R]                  # [E, R] hoisted key proj

    inv_sqrt_e = 1.0 / math.sqrt(E)

    # zero the packed output row once (pad lanes + the zero loss column)
    out_ref[...] = jnp.zeros_like(out_ref)

    # ---- fused embedding gather (token ids live in SMEM via scalar prefetch) ----
    BS = B * S
    row_iota = jax.lax.broadcasted_iota(jnp.int32, (BS, R + 1), 0)
    col_iota = jax.lax.broadcasted_iota(jnp.int32, (BS, R + 1), 1)
    onehot = jnp.zeros((BS, R + 1), f32)
    for b in range(B):
        for s in range(S):
            onehot = jnp.where(row_iota == (b * S + s),
                               (col_iota == tok_ref[b, s]).astype(f32), onehot)
    x_cat = dot(onehot, emb_all)                                    # [B*S, E]
    cur = [x_cat[b * S:(b + 1) * S, :] for b in range(B)]           # per-batch [S, E]

    def gru_pairs(cur_list, n):
        """2-step GRU (h0=0) over every adjacent row pair of every batch element.
        All batch elements share one fused input-side matmul and one fused
        hidden-side matmul (rows stacked along sublanes)."""
        x_all = jnp.concatenate(cur_list, axis=0)                   # [B*(n+1), E]
        gi = dot(x_all, wihT) + bih                                 # [B*(n+1), 3E]
        gi1 = jnp.concatenate(
            [gi[b * (n + 1):b * (n + 1) + n, :] for b in range(B)], axis=0)
        gi2 = jnp.concatenate(
            [gi[b * (n + 1) + 1:b * (n + 1) + n + 1, :] for b in range(B)], axis=0)
        r1 = jax.nn.sigmoid(gi1[:, 0:E] + bhr)
        z1 = jax.nn.sigmoid(gi1[:, E:2 * E] + bhz)
        n1 = jnp.tanh(gi1[:, 2 * E:3 * E] + r1 * bhn)
        h1 = (1.0 - z1) * n1                                        # step-1 hidden
        gh = dot(h1, whhT) + bhh                                    # [B*n, 3E]
        r2 = jax.nn.sigmoid(gi2[:, 0:E] + gh[:, 0:E])
        z2 = jax.nn.sigmoid(gi2[:, E:2 * E] + gh[:, E:2 * E])
        n2 = jnp.tanh(gi2[:, 2 * E:3 * E] + r2 * gh[:, 2 * E:3 * E])
        h2 = (1.0 - z2) * n2 + z2 * h1                              # [B*n, E]
        return h2, [h2[b * n:(b + 1) * n, :] for b in range(B)]

    def attend(x_bm):
        """transformer_attention + softmax + entropy + weightedAverage for a batch
        of length-1 'sequences' x_bm [B, E]; keys are [relation_emb ; x_b]."""
        q = dot(x_bm, wqT) + bq                                     # [B, E]
        k_x = dot(x_bm, wkT) + bk                                   # [B, E]
        s_rel = dot(q, k_relT) * inv_sqrt_e                         # [B, R]
        s_x = jnp.sum(q * k_x, axis=-1, keepdims=True) * inv_sqrt_e # [B, 1]
        m = jnp.maximum(jnp.max(s_rel, axis=-1, keepdims=True), s_x)
        p_rel = jnp.exp(s_rel - m)
        p_x = jnp.exp(s_x - m)
        denom = jnp.sum(p_rel, axis=-1, keepdims=True) + p_x        # [B, 1]
        inv = 1.0 / denom                                           # exact (parity)
        probs_rel = p_rel * inv
        probs_x = p_x * inv
        # entropy in log-sum-exp form -> no log(probs) (no 0*log(0) NaN hazard)
        ent = jnp.log(denom) - (jnp.sum(p_rel * (s_rel - m), axis=-1, keepdims=True)
                                + p_x * (s_x - m)) * inv            # [B, 1]
        # prob @ [relation_emb ; x]  (weightedAverage; mask is all-False for len 1)
        wavg = dot(probs_rel, rel_emb) + probs_x * x_bm             # [B, E]
        return s_rel, s_x, wavg, ent

    step = 0
    cur_len = S
    while cur_len > 1:                     # unrolled at trace time (S static, tiny)
        if cur_len > 2:
            n = cur_len - 1
            h2_cat, h2_list = gru_pairs(cur, n)
            # pair score head: VPU lane reduction instead of a width-1 MXU matmul
            score_cat = jax.nn.sigmoid(
                jnp.sum(h2_cat * fcw, axis=-1, keepdims=True) + fcb)       # [B*n, 1]
            sel_rows, sel_info = [], []
            for b in range(B):
                score = score_cat[b * n:(b + 1) * n, :]                    # [n, 1]
                ids = jax.lax.broadcasted_iota(jnp.int32, (n, 1), 0).astype(f32)
                smax = jnp.max(score, axis=0, keepdims=True)
                # first argmax = min index among maxima (min via negate-max)
                sel = -jnp.max(jnp.where(score >= smax, -ids, -float(n)),
                               axis=0, keepdims=True)                      # [1, 1]
                onehot_sel = (ids == sel).astype(f32)                      # [n, 1]
                sel_rows.append(jnp.sum(h2_list[b] * onehot_sel,
                                        axis=0, keepdims=True))            # [1, E]
                sel_info.append((ids, sel))
            selected = jnp.concatenate(sel_rows, axis=0)                   # [B, E]
            _, _, wavg, ent = attend(selected)
            out_ref[:, R + 1 + step:R + 2 + step] = ent                    # loss col
            new_cur = []
            for b in range(B):
                ids, sel = sel_info[b]
                cb = cur[b]
                base = cb[0:cur_len - 1, :]
                shifted = cb[1:cur_len, :]
                # TODO(synk): reference drops *any* zero-sum row after zeroing row
                # sel+1; we statically drop only row sel+1 (identical unless some
                # other row sums exactly to 0, e.g. the padding_idx embedding).
                new_cur.append(jnp.where(ids < sel, base,
                               jnp.where(ids == sel, wavg[b:b + 1, :], shifted)))
            cur = new_cur
        else:
            # reference: for a length-2 sequence just run the GRU; loss stays 0
            _, cur = gru_pairs(cur, 1)                                     # B x [1, E]
            # (loss column already zero from the zero-init above)
        cur_len -= 1
        step += 1

    # final transformer_attention + softmax entropy on the length-1 sequences
    final = jnp.concatenate(cur, axis=0)                                   # [B, E]
    s_rel, s_x, _, ent = attend(final)
    out_ref[:, 0:R] = s_rel
    out_ref[:, R:R + 1] = s_x
    out_ref[:, R + 1 + step:R + 2 + step] = ent


# ----------------------------------------------------------------------------
# Wrapper
# ----------------------------------------------------------------------------
def encoder_forward(token_ids, slab, *, relation_num, emb_size):
    """token_ids [B,S] int32, slab [rows,128] f32 -> (scores [B,R+1], loss [B,S])."""
    B, S = token_ids.shape
    R, E = relation_num, emb_size
    L = _slab_layout(R, E)
    assert slab.shape == (L['rows'], SLAB_LANES)
    assert R + 1 + S <= OUT_LANES

    kernel = functools.partial(_encoder_kernel, batch=B, seq_len=S,
                               relation_num=R, emb_size=E, layout=L)

    grid_spec = pltpu.PrefetchScalarGridSpec(
        num_scalar_prefetch=1,                    # token ids -> SMEM
        grid=(1,),                                # single step; batch handled in-kernel
        in_specs=[pl.BlockSpec((L['rows'], SLAB_LANES), lambda i, tok: (0, 0))],
        out_specs=pl.BlockSpec((B, OUT_LANES), lambda i, tok: (0, 0)),
    )

    out = pl.pallas_call(
        kernel,
        grid_spec=grid_spec,
        out_shape=jax.ShapeDtypeStruct((B, OUT_LANES), jnp.float32),
        compiler_params=pltpu.CompilerParams(dimension_semantics=("arbitrary",)),
    )(token_ids, slab)

    scores = out[:, 0:R + 1]                      # predict_head -> [B, R+1]
    loss = out[:, R + 1:R + 1 + S]                # [B, S]
    return scores, loss


# ----------------------------------------------------------------------------
# Parameters (deterministic, synthetic) + one-time slab packing
# ----------------------------------------------------------------------------
def init_params(key, relation_num, emb_size):
    R, E = relation_num, emb_size
    ks = jax.random.split(key, 11)
    s = 0.2
    emb = jax.random.normal(ks[0], (R + 1, E), jnp.float32) * s
    emb = emb.at[R].set(0.0)                      # padding_idx row is zero
    return dict(
        emb=emb,
        w_ih=jax.random.normal(ks[1], (3 * E, E), jnp.float32) * s,
        w_hh=jax.random.normal(ks[2], (3 * E, E), jnp.float32) * s,
        b_ih=jax.random.normal(ks[3], (3 * E,), jnp.float32) * s,
        b_hh=jax.random.normal(ks[4], (3 * E,), jnp.float32) * s,
        fc_w=jax.random.normal(ks[5], (1, E), jnp.float32) * s,
        fc_b=jax.random.normal(ks[6], (1,), jnp.float32) * s,
        wq=jax.random.normal(ks[7], (E, E), jnp.float32) * s,
        bq=jax.random.normal(ks[8], (E,), jnp.float32) * s,
        wk=jax.random.normal(ks[9], (E, E), jnp.float32) * s,
        bk=jax.random.normal(ks[10], (E,), jnp.float32) * s,
        # fc_v exists in the reference __init__ but is never used in forward.
    )


def build_param_slab(p, relation_num, emb_size):
    """One-time parameter prep: pack every weight/bias (and the constant key
    projection of the relation embeddings) into a single lane-dense [rows,128]
    f32 slab so the kernel needs exactly one parameter operand / DMA."""
    R, E = relation_num, emb_size
    L = _slab_layout(R, E)
    slab = jnp.zeros((L['rows'], SLAB_LANES), jnp.float32)
    slab = slab.at[L['emb']:L['emb'] + R + 1, 0:E].set(p['emb'])
    slab = slab.at[L['gru_w']:L['gru_w'] + E, 0:3 * E].set(p['w_ih'].T)
    slab = slab.at[L['gru_w'] + E:L['gru_w'] + 2 * E, 0:3 * E].set(p['w_hh'].T)
    slab = slab.at[L['gru_b'], 0:3 * E].set(p['b_ih'])
    slab = slab.at[L['gru_b'] + 1, 0:3 * E].set(p['b_hh'])
    slab = slab.at[L['fc'], 0:E].set(p['fc_w'][0])
    slab = slab.at[L['fc'], E].set(p['fc_b'][0])
    slab = slab.at[L['attn_w']:L['attn_w'] + E, 0:E].set(p['wq'].T)
    slab = slab.at[L['attn_w'] + E:L['attn_w'] + 2 * E, 0:E].set(p['wk'].T)
    slab = slab.at[L['attn_b'], 0:E].set(p['bq'])
    slab = slab.at[L['attn_b'] + 1, 0:E].set(p['bk'])
    # fc_k(relation_emb) is input-independent -> precompute its transpose once so
    # attend() never re-lowers a transposed contraction on the critical path.
    k_rel = p['emb'][:R] @ p['wk'].T + p['bk']                    # [R, E]
    slab = slab.at[L['krelT']:L['krelT'] + E, 0:R].set(k_rel.T)   # [E, R]
    return slab


if __name__ == "__main__":
    key = jax.random.PRNGKey(0)
    pkey, ikey = jax.random.split(key)
    params = init_params(pkey, RELATION_NUM, EMB_SIZE)
    slab = build_param_slab(params, RELATION_NUM, EMB_SIZE)       # one-time prep

    # avoid padding_idx tokens (their zero embedding would be filtered in the reference)
    token_ids = jax.random.randint(ikey, (BATCH, SEQ_LEN), 0, RELATION_NUM,
                                   dtype=jnp.int32)

    fwd = jax.jit(functools.partial(encoder_forward, relation_num=RELATION_NUM,
                                    emb_size=EMB_SIZE))
    scores, loss = fwd(token_ids, slab)
    scores = jax.block_until_ready(scores)
    loss = jax.block_until_ready(loss)

    assert scores.shape == (BATCH, RELATION_NUM + 1)
    assert loss.shape == (BATCH, SEQ_LEN)
    assert bool(jnp.all(jnp.isfinite(scores))) and bool(jnp.all(jnp.isfinite(loss)))
    print("KERNEL_OK")
</pallas_src>

<mosaic_0001>
module attributes {stable_mosaic.version = 11 : i64} {
  func.func @_encoder_kernel(%arg0: i32, %arg1: memref<2x4xi32, #tpu.memory_space<smem>>, %arg2: memref<192x128xf32, #tpu.memory_space<vmem>>, %arg3: memref<2x128xf32, #tpu.memory_space<vmem>>) attributes {dimension_semantics = [#tpu.dimension_semantics<arbitrary>], iteration_bounds = array<i64: 1>, scalar_prefetch = 1 : i64, scratch_operands = 0 : i64, tpu.core_type = #tpu.core_type<tc>, window_params = [{pipeline_mode = #tpu.pipeline_mode<synchronous>, transform_indices = @transform_0, window_bounds = array<i64: 192, 128>}, {pipeline_mode = #tpu.pipeline_mode<synchronous>, transform_indices = @transform_1, window_bounds = array<i64: 2, 128>}]} {
    %c0 = arith.constant 0 : index
    %c0_0 = arith.constant 0 : index
    %0 = vector.load %arg2[%c0, %c0_0] : memref<192x128xf32, #tpu.memory_space<vmem>>, vector<5x32xf32>
    %1 = vector.extract_strided_slice %0 {offsets = [0, 0], sizes = [4, 32], strides = [1, 1]} : vector<5x32xf32> to vector<4x32xf32>
    %c8 = arith.constant 8 : index
    %c0_1 = arith.constant 0 : index
    %2 = vector.load %arg2[%c8, %c0_1] : memref<192x128xf32, #tpu.memory_space<vmem>>, vector<32x96xf32>
    %c40 = arith.constant 40 : index
    %c0_2 = arith.constant 0 : index
    %3 = vector.load %arg2[%c40, %c0_2] : memref<192x128xf32, #tpu.memory_space<vmem>>, vector<32x96xf32>
    %c72 = arith.constant 72 : index
    %c0_3 = arith.constant 0 : index
    %4 = vector.load %arg2[%c72, %c0_3] : memref<192x128xf32, #tpu.memory_space<vmem>>, vector<2x96xf32>
    %5 = vector.extract_strided_slice %4 {offsets = [0, 0], sizes = [1, 96], strides = [1, 1]} : vector<2x96xf32> to vector<1x96xf32>
    %6 = vector.extract_strided_slice %4 {offsets = [1, 0], sizes = [1, 96], strides = [1, 1]} : vector<2x96xf32> to vector<1x96xf32>
    %7 = vector.extract_strided_slice %6 {offsets = [0, 0], sizes = [1, 32], strides = [1, 1]} : vector<1x96xf32> to vector<1x32xf32>
    %8 = vector.extract_strided_slice %6 {offsets = [0, 32], sizes = [1, 32], strides = [1, 1]} : vector<1x96xf32> to vector<1x32xf32>
    %9 = vector.extract_strided_slice %6 {offsets = [0, 64], sizes = [1, 32], strides = [1, 1]} : vector<1x96xf32> to vector<1x32xf32>
    %c80 = arith.constant 80 : index
    %c0_4 = arith.constant 0 : index
    %10 = vector.load %arg2[%c80, %c0_4] : memref<192x128xf32, #tpu.memory_space<vmem>>, vector<1x33xf32>
    %11 = vector.extract_strided_slice %10 {offsets = [0, 0], sizes = [1, 32], strides = [1, 1]} : vector<1x33xf32> to vector<1x32xf32>
    %12 = vector.extract_strided_slice %10 {offsets = [0, 32], sizes = [1, 1], strides = [1, 1]} : vector<1x33xf32> to vector<1x1xf32>
    %c88 = arith.constant 88 : index
    %c0_5 = arith.constant 0 : index
    %13 = vector.load %arg2[%c88, %c0_5] : memref<192x128xf32, #tpu.memory_space<vmem>>, vector<32x32xf32>
    %c120 = arith.constant 120 : index
    %c0_6 = arith.constant 0 : index
    %14 = vector.load %arg2[%c120, %c0_6] : memref<192x128xf32, #tpu.memory_space<vmem>>, vector<32x32xf32>
    %c152 = arith.constant 152 : index
    %c0_7 = arith.constant 0 : index
    %15 = vector.load %arg2[%c152, %c0_7] : memref<192x128xf32, #tpu.memory_space<vmem>>, vector<2x32xf32>
    %16 = vector.extract_strided_slice %15 {offsets = [0, 0], sizes = [1, 32], strides = [1, 1]} : vector<2x32xf32> to vector<1x32xf32>
    %17 = vector.extract_strided_slice %15 {offsets = [1, 0], sizes = [1, 32], strides = [1, 1]} : vector<2x32xf32> to vector<1x32xf32>
    %c160 = arith.constant 160 : index
    %c0_8 = arith.constant 0 : index
    %18 = vector.load %arg2[%c160, %c0_8] : memref<192x128xf32, #tpu.memory_space<vmem>>, vector<32x4xf32>
    %cst = arith.constant 0.000000e+00 : f32
    %19 = vector.broadcast %cst : f32 to vector<2x128xf32>
    %c0_9 = arith.constant 0 : index
    %c0_10 = arith.constant 0 : index
    %20 = vector.load %arg3[%c0_9, %c0_10] : memref<2x128xf32, #tpu.memory_space<vmem>>, vector<2x128xf32>
    tpu.vector_store %arg3[%c0_9, %c0_10], %19 {strides = array<i32>} : memref<2x128xf32, #tpu.memory_space<vmem>>, vector<2x128xf32>,
    %21 = tpu.iota {dimensions = array<i32: 0>} : vector<8x5xi32>
    %22 = tpu.iota {dimensions = array<i32: 1>} : vector<8x5xi32>
    %cst_11 = arith.constant 0.000000e+00 : f32
    %23 = vector.broadcast %cst_11 : f32 to vector<8x5xf32>
    %c0_i32 = arith.constant 0 : i32
    %24 = vector.broadcast %c0_i32 : i32 to vector<8x5xi32>
    %25 = arith.cmpi eq, %21, %24 : vector<8x5xi32>
    %c0_12 = arith.constant 0 : index
    %c0_13 = arith.constant 0 : index
    %26 = memref.load %arg1[%c0_12, %c0_13] : memref<2x4xi32, #tpu.memory_space<smem>>
    %27 = vector.broadcast %26 : i32 to vector<8x5xi32>
    %28 = arith.cmpi eq, %22, %27 : vector<8x5xi32>
    %29 = arith.extui %28 : vector<8x5xi1> to vector<8x5xi32>
    %30 = arith.sitofp %29 : vector<8x5xi32> to vector<8x5xf32>
    %31 = arith.select %25, %30, %23 : vector<8x5xi1>, vector<8x5xf32>
    %c1_i32 = arith.constant 1 : i32
    %32 = vector.broadcast %c1_i32 : i32 to vector<8x5xi32>
    %33 = arith.cmpi eq, %21, %32 : vector<8x5xi32>
    %c0_14 = arith.constant 0 : index
    %c1 = arith.constant 1 : index
    %34 = memref.load %arg1[%c0_14, %c1] : memref<2x4xi32, #tpu.memory_space<smem>>
    %35 = vector.broadcast %34 : i32 to vector<8x5xi32>
    %36 = arith.cmpi eq, %22, %35 : vector<8x5xi32>
    %37 = arith.extui %36 : vector<8x5xi1> to vector<8x5xi32>
    %38 = arith.sitofp %37 : vector<8x5xi32> to vector<8x5xf32>
    %39 = arith.select %33, %38, %31 : vector<8x5xi1>, vector<8x5xf32>
    %c2_i32 = arith.constant 2 : i32
    %40 = vector.broadcast %c2_i32 : i32 to vector<8x5xi32>
    %41 = arith.cmpi eq, %21, %40 : vector<8x5xi32>
    %c0_15 = arith.constant 0 : index
    %c2 = arith.constant 2 : index
    %42 = memref.load %arg1[%c0_15, %c2] : memref<2x4xi32, #tpu.memory_space<smem>>
    %43 = vector.broadcast %42 : i32 to vector<8x5xi32>
    %44 = arith.cmpi eq, %22, %43 : vector<8x5xi32>
    %45 = arith.extui %44 : vector<8x5xi1> to vector<8x5xi32>
    %46 = arith.sitofp %45 : vector<8x5xi32> to vector<8x5xf32>
    %47 = arith.select %41, %46, %39 : vector<8x5xi1>, vector<8x5xf32>
    %c3_i32 = arith.constant 3 : i32
    %48 = vector.broadcast %c3_i32 : i32 to vector<8x5xi32>
    %49 = arith.cmpi eq, %21, %48 : vector<8x5xi32>
    %c0_16 = arith.constant 0 : index
    %c3 = arith.constant 3 : index
    %50 = memref.load %arg1[%c0_16, %c3] : memref<2x4xi32, #tpu.memory_space<smem>>
    %51 = vector.broadcast %50 : i32 to vector<8x5xi32>
    %52 = arith.cmpi eq, %22, %51 : vector<8x5xi32>
    %53 = arith.extui %52 : vector<8x5xi1> to vector<8x5xi32>
    %54 = arith.sitofp %53 : vector<8x5xi32> to vector<8x5xf32>
    %55 = arith.select %49, %54, %47 : vector<8x5xi1>, vector<8x5xf32>
    %c4_i32 = arith.constant 4 : i32
    %56 = vector.broadcast %c4_i32 : i32 to vector<8x5xi32>
    %57 = arith.cmpi eq, %21, %56 : vector<8x5xi32>
    %c1_17 = arith.constant 1 : index
    %c0_18 = arith.constant 0 : index
    %58 = memref.load %arg1[%c1_17, %c0_18] : memref<2x4xi32, #tpu.memory_space<smem>>
    %59 = vector.broadcast %58 : i32 to vector<8x5xi32>
    %60 = arith.cmpi eq, %22, %59 : vector<8x5xi32>
    %61 = arith.extui %60 : vector<8x5xi1> to vector<8x5xi32>
    %62 = arith.sitofp %61 : vector<8x5xi32> to vector<8x5xf32>
    %63 = arith.select %57, %62, %55 : vector<8x5xi1>, vector<8x5xf32>
    %c5_i32 = arith.constant 5 : i32
    %64 = vector.broadcast %c5_i32 : i32 to vector<8x5xi32>
    %65 = arith.cmpi eq, %21, %64 : vector<8x5xi32>
    %c1_19 = arith.constant 1 : index
    %c1_20 = arith.constant 1 : index
    %66 = memref.load %arg1[%c1_19, %c1_20] : memref<2x4xi32, #tpu.memory_space<smem>>
    %67 = vector.broadcast %66 : i32 to vector<8x5xi32>
    %68 = arith.cmpi eq, %22, %67 : vector<8x5xi32>
    %69 = arith.extui %68 : vector<8x5xi1> to vector<8x5xi32>
    %70 = arith.sitofp %69 : vector<8x5xi32> to vector<8x5xf32>
    %71 = arith.select %65, %70, %63 : vector<8x5xi1>, vector<8x5xf32>
    %c6_i32 = arith.constant 6 : i32
    %72 = vector.broadcast %c6_i32 : i32 to vector<8x5xi32>
    %73 = arith.cmpi eq, %21, %72 : vector<8x5xi32>
    %c1_21 = arith.constant 1 : index
    %c2_22 = arith.constant 2 : index
    %74 = memref.load %arg1[%c1_21, %c2_22] : memref<2x4xi32, #tpu.memory_space<smem>>
    %75 = vector.broadcast %74 : i32 to vector<8x5xi32>
    %76 = arith.cmpi eq, %22, %75 : vector<8x5xi32>
    %77 = arith.extui %76 : vector<8x5xi1> to vector<8x5xi32>
    %78 = arith.sitofp %77 : vector<8x5xi32> to vector<8x5xf32>
    %79 = arith.select %73, %78, %71 : vector<8x5xi1>, vector<8x5xf32>
    %c7_i32 = arith.constant 7 : i32
    %80 = vector.broadcast %c7_i32 : i32 to vector<8x5xi32>
    %81 = arith.cmpi eq, %21, %80 : vector<8x5xi32>
    %c1_23 = arith.constant 1 : index
    %c3_24 = arith.constant 3 : index
    %82 = memref.load %arg1[%c1_23, %c3_24] : memref<2x4xi32, #tpu.memory_space<smem>>
    %83 = vector.broadcast %82 : i32 to vector<8x5xi32>
    %84 = arith.cmpi eq, %22, %83 : vector<8x5xi32>
    %85 = arith.extui %84 : vector<8x5xi1> to vector<8x5xi32>
    %86 = arith.sitofp %85 : vector<8x5xi32> to vector<8x5xf32>
    %87 = arith.select %81, %86, %79 : vector<8x5xi1>, vector<8x5xf32>
    %cst_25 = arith.constant dense<0.000000e+00> : vector<8x32xf32>
    %88 = tpu.matmul %87, %0, %cst_25 {dimension_numbers = #tpu.dot_dimension_numbers<[1], [0], [0], [1], [0, 0, 1, 1], [], []>} : vector<8x5xf32>, vector<5x32xf32>, vector<8x32xf32> -> vector<8x32xf32>
    %89 = vector.extract_strided_slice %88 {offsets = [0, 0], sizes = [4, 32], strides = [1, 1]} : vector<8x32xf32> to vector<4x32xf32>
    %90 = vector.extract_strided_slice %88 {offsets = [4, 0], sizes = [4, 32], strides = [1, 1]} : vector<8x32xf32> to vector<4x32xf32>
    %91 = tpu.concatenate %89, %90 in 0 : vector<4x32xf32>, vector<4x32xf32> -> vector<8x32xf32>
    %cst_26 = arith.constant dense<0.000000e+00> : vector<8x96xf32>
    %92 = tpu.matmul %91, %2, %cst_26 {dimension_numbers = #tpu.dot_dimension_numbers<[1], [0], [0], [1], [0, 0, 1, 1], [], []>} : vector<8x32xf32>, vector<32x96xf32>, vector<8x96xf32> -> vector<8x96xf32>
    %93 = vector.broadcast %5 : vector<1x96xf32> to vector<8x96xf32>
    %94 = arith.addf %92, %93 : vector<8x96xf32>
    %95 = vector.extract_strided_slice %94 {offsets = [0, 0], sizes = [3, 96], strides = [1, 1]} : vector<8x96xf32> to vector<3x96xf32>
    %96 = vector.extract_strided_slice %94 {offsets = [4, 0], sizes = [3, 96], strides = [1, 1]} : vector<8x96xf32> to vector<3x96xf32>
    %97 = tpu.concatenate %95, %96 in 0 : vector<3x96xf32>, vector<3x96xf32> -> vector<6x96xf32>
    %98 = vector.extract_strided_slice %94 {offsets = [1, 0], sizes = [3, 96], strides = [1, 1]} : vector<8x96xf32> to vector<3x96xf32>
    %99 = vector.extract_strided_slice %94 {offsets = [5, 0], sizes = [3, 96], strides = [1, 1]} : vector<8x96xf32> to vector<3x96xf32>
    %100 = tpu.concatenate %98, %99 in 0 : vector<3x96xf32>, vector<3x96xf32> -> vector<6x96xf32>
    %101 = vector.extract_strided_slice %97 {offsets = [0, 0], sizes = [6, 32], strides = [1, 1]} : vector<6x96xf32> to vector<6x32xf32>
    %102 = vector.broadcast %7 : vector<1x32xf32> to vector<6x32xf32>
    %103 = arith.addf %101, %102 : vector<6x32xf32>
    %104 = arith.negf %103 : vector<6x32xf32>
    %105 = math.exp %104 : vector<6x32xf32>
    %cst_27 = arith.constant 1.000000e+00 : f32
    %106 = vector.broadcast %cst_27 : f32 to vector<6x32xf32>
    %107 = arith.addf %106, %105 : vector<6x32xf32>
    %108 = arith.divf %106, %107 : vector<6x32xf32>
    %109 = vector.extract_strided_slice %97 {offsets = [0, 32], sizes = [6, 32], strides = [1, 1]} : vector<6x96xf32> to vector<6x32xf32>
    %110 = vector.broadcast %8 : vector<1x32xf32> to vector<6x32xf32>
    %111 = arith.addf %109, %110 : vector<6x32xf32>
    %112 = arith.negf %111 : vector<6x32xf32>
    %113 = math.exp %112 : vector<6x32xf32>
    %cst_28 = arith.constant 1.000000e+00 : f32
    %114 = vector.broadcast %cst_28 : f32 to vector<6x32xf32>
    %115 = arith.addf %114, %113 : vector<6x32xf32>
    %116 = arith.divf %114, %115 : vector<6x32xf32>
    %117 = vector.extract_strided_slice %97 {offsets = [0, 64], sizes = [6, 32], strides = [1, 1]} : vector<6x96xf32> to vector<6x32xf32>
    %118 = vector.broadcast %9 : vector<1x32xf32> to vector<6x32xf32>
    %119 = arith.mulf %108, %118 : vector<6x32xf32>
    %120 = arith.addf %117, %119 : vector<6x32xf32>
    %121 = math.tanh %120 : vector<6x32xf32>
    %cst_29 = arith.constant 1.000000e+00 : f32
    %122 = vector.broadcast %cst_29 : f32 to vector<6x32xf32>
    %123 = arith.subf %122, %116 : vector<6x32xf32>
    %124 = arith.mulf %123, %121 : vector<6x32xf32>
    %cst_30 = arith.constant dense<0.000000e+00> : vector<6x96xf32>
    %125 = tpu.matmul %124, %3, %cst_30 {dimension_numbers = #tpu.dot_dimension_numbers<[1], [0], [0], [1], [0, 0, 1, 1], [], []>} : vector<6x32xf32>, vector<32x96xf32>, vector<6x96xf32> -> vector<6x96xf32>
    %126 = vector.broadcast %6 : vector<1x96xf32> to vector<6x96xf32>
    %127 = arith.addf %125, %126 : vector<6x96xf32>
    %128 = vector.extract_strided_slice %100 {offsets = [0, 0], sizes = [6, 32], strides = [1, 1]} : vector<6x96xf32> to vector<6x32xf32>
    %129 = vector.extract_strided_slice %127 {offsets = [0, 0], sizes = [6, 32], strides = [1, 1]} : vector<6x96xf32> to vector<6x32xf32>
    %130 = arith.addf %128, %129 : vector<6x32xf32>
    %131 = arith.negf %130 : vector<6x32xf32>
    %132 = math.exp %131 : vector<6x32xf32>
    %cst_31 = arith.constant 1.000000e+00 : f32
    %133 = vector.broadcast %cst_31 : f32 to vector<6x32xf32>
    %134 = arith.addf %133, %132 : vector<6x32xf32>
    %135 = arith.divf %133, %134 : vector<6x32xf32>
    %136 = vector.extract_strided_slice %100 {offsets = [0, 32], sizes = [6, 32], strides = [1, 1]} : vector<6x96xf32> to vector<6x32xf32>
    %137 = vector.extract_strided_slice %127 {offsets = [0, 32], sizes = [6, 32], strides = [1, 1]} : vector<6x96xf32> to vector<6x32xf32>
    %138 = arith.addf %136, %137 : vector<6x32xf32>
    %139 = arith.negf %138 : vector<6x32xf32>
    %140 = math.exp %139 : vector<6x32xf32>
    %cst_32 = arith.constant 1.000000e+00 : f32
    %141 = vector.broadcast %cst_32 : f32 to vector<6x32xf32>
    %142 = arith.addf %141, %140 : vector<6x32xf32>
    %143 = arith.divf %141, %142 : vector<6x32xf32>
    %144 = vector.extract_strided_slice %100 {offsets = [0, 64], sizes = [6, 32], strides = [1, 1]} : vector<6x96xf32> to vector<6x32xf32>
    %145 = vector.extract_strided_slice %127 {offsets = [0, 64], sizes = [6, 32], strides = [1, 1]} : vector<6x96xf32> to vector<6x32xf32>
    %146 = arith.mulf %135, %145 : vector<6x32xf32>
    %147 = arith.addf %144, %146 : vector<6x32xf32>
    %148 = math.tanh %147 : vector<6x32xf32>
    %cst_33 = arith.constant 1.000000e+00 : f32
    %149 = vector.broadcast %cst_33 : f32 to vector<6x32xf32>
    %150 = arith.subf %149, %143 : vector<6x32xf32>
    %151 = arith.mulf %150, %148 : vector<6x32xf32>
    %152 = arith.mulf %143, %124 : vector<6x32xf32>
    %153 = arith.addf %151, %152 : vector<6x32xf32>
    %154 = vector.extract_strided_slice %153 {offsets = [0, 0], sizes = [3, 32], strides = [1, 1]} : vector<6x32xf32> to vector<3x32xf32>
    %155 = vector.extract_strided_slice %153 {offsets = [3, 0], sizes = [3, 32], strides = [1, 1]} : vector<6x32xf32> to vector<3x32xf32>
    %156 = vector.broadcast %11 : vector<1x32xf32> to vector<6x32xf32>
    %157 = arith.mulf %153, %156 : vector<6x32xf32>
    %cst_34 = arith.constant dense<0.000000e+00> : vector<6xf32>
    %158 = vector.multi_reduction <add>, %157, %cst_34 [1] : vector<6x32xf32> to vector<6xf32>
    %159 = vector.shape_cast %158 : vector<6xf32> to vector<6x1xf32>
    %160 = vector.broadcast %12 : vector<1x1xf32> to vector<6x1xf32>
    %161 = arith.addf %159, %160 : vector<6x1xf32>
    %162 = arith.negf %161 : vector<6x1xf32>
    %163 = math.exp %162 : vector<6x1xf32>
    %cst_35 = arith.constant 1.000000e+00 : f32
    %164 = vector.broadcast %cst_35 : f32 to vector<6x1xf32>
    %165 = arith.addf %164, %163 : vector<6x1xf32>
    %166 = arith.divf %164, %165 : vector<6x1xf32>
    %167 = vector.extract_strided_slice %166 {offsets = [0, 0], sizes = [3, 1], strides = [1, 1]} : vector<6x1xf32> to vector<3x1xf32>
    %168 = tpu.iota {dimensions = array<i32: 0>} : vector<3x1xi32>
    %169 = arith.sitofp %168 : vector<3x1xi32> to vector<3x1xf32>
    %cst_36 = arith.constant dense<0xFF800000> : vector<1xf32>
    %170 = vector.multi_reduction <maximumf>, %167, %cst_36 [0] : vector<3x1xf32> to vector<1xf32>
    %171 = vector.shape_cast %170 : vector<1xf32> to vector<1x1xf32>
    %172 = vector.broadcast %171 : vector<1x1xf32> to vector<3x1xf32>
    %173 = arith.cmpf oge, %167, %172 : vector<3x1xf32>
    %cst_37 = arith.constant 0.000000e+00 : f32
    %174 = vector.broadcast %cst_37 : f32 to vector<3x1xf32>
    %175 = arith.subf %174, %169 : vector<3x1xf32>
    %cst_38 = arith.constant -3.000000e+00 : f32
    %176 = vector.broadcast %cst_38 : f32 to vector<3x1xf32>
    %177 = arith.select %173, %175, %176 : vector<3x1xi1>, vector<3x1xf32>
    %cst_39 = arith.constant dense<0xFF800000> : vector<1xf32>
    %178 = vector.multi_reduction <maximumf>, %177, %cst_39 [0] : vector<3x1xf32> to vector<1xf32>
    %179 = vector.shape_cast %178 : vector<1xf32> to vector<1x1xf32>
    %cst_40 = arith.constant 0.000000e+00 : f32
    %180 = vector.broadcast %cst_40 : f32 to vector<1x1xf32>
    %181 = arith.subf %180, %179 : vector<1x1xf32>
    %182 = vector.broadcast %181 : vector<1x1xf32> to vector<3x1xf32>
    %183 = arith.cmpf oeq, %169, %182 : vector<3x1xf32>
    %184 = arith.extui %183 : vector<3x1xi1> to vector<3x1xi32>
    %185 = arith.sitofp %184 : vector<3x1xi32> to vector<3x1xf32>
    %186 = vector.broadcast %185 : vector<3x1xf32> to vector<3x32xf32>
    %187 = arith.mulf %154, %186 : vector<3x32xf32>
    %cst_41 = arith.constant dense<0.000000e+00> : vector<32xf32>
    %188 = vector.multi_reduction <add>, %187, %cst_41 [0] : vector<3x32xf32> to vector<32xf32>
    %189 = vector.shape_cast %188 : vector<32xf32> to vector<1x32xf32>
    %190 = vector.extract_strided_slice %166 {offsets = [3, 0], sizes = [3, 1], strides = [1, 1]} : vector<6x1xf32> to vector<3x1xf32>
    %191 = tpu.iota {dimensions = array<i32: 0>} : vector<3x1xi32>
    %192 = arith.sitofp %191 : vector<3x1xi32> to vector<3x1xf32>
    %cst_42 = arith.constant dense<0xFF800000> : vector<1xf32>
    %193 = vector.multi_reduction <maximumf>, %190, %cst_42 [0] : vector<3x1xf32> to vector<1xf32>
    %194 = vector.shape_cast %193 : vector<1xf32> to vector<1x1xf32>
    %195 = vector.broadcast %194 : vector<1x1xf32> to vector<3x1xf32>
    %196 = arith.cmpf oge, %190, %195 : vector<3x1xf32>
    %cst_43 = arith.constant 0.000000e+00 : f32
    %197 = vector.broadcast %cst_43 : f32 to vector<3x1xf32>
    %198 = arith.subf %197, %192 : vector<3x1xf32>
    %cst_44 = arith.constant -3.000000e+00 : f32
    %199 = vector.broadcast %cst_44 : f32 to vector<3x1xf32>
    %200 = arith.select %196, %198, %199 : vector<3x1xi1>, vector<3x1xf32>
    %cst_45 = arith.constant dense<0xFF800000> : vector<1xf32>
    %201 = vector.multi_reduction <maximumf>, %200, %cst_45 [0] : vector<3x1xf32> to vector<1xf32>
    %202 = vector.shape_cast %201 : vector<1xf32> to vector<1x1xf32>
    %cst_46 = arith.constant 0.000000e+00 : f32
    %203 = vector.broadcast %cst_46 : f32 to vector<1x1xf32>
    %204 = arith.subf %203, %202 : vector<1x1xf32>
    %205 = vector.broadcast %204 : vector<1x1xf32> to vector<3x1xf32>
    %206 = arith.cmpf oeq, %192, %205 : vector<3x1xf32>
    %207 = arith.extui %206 : vector<3x1xi1> to vector<3x1xi32>
    %208 = arith.sitofp %207 : vector<3x1xi32> to vector<3x1xf32>
    %209 = vector.broadcast %208 : vector<3x1xf32> to vector<3x32xf32>
    %210 = arith.mulf %155, %209 : vector<3x32xf32>
    %cst_47 = arith.constant dense<0.000000e+00> : vector<32xf32>
    %211 = vector.multi_reduction <add>, %210, %cst_47 [0] : vector<3x32xf32> to vector<32xf32>
    %212 = vector.shape_cast %211 : vector<32xf32> to vector<1x32xf32>
    %213 = tpu.concatenate %189, %212 in 0 : vector<1x32xf32>, vector<1x32xf32> -> vector<2x32xf32>
    %cst_48 = arith.constant dense<0.000000e+00> : vector<2x32xf32>
    %214 = tpu.matmul %213, %13, %cst_48 {dimension_numbers = #tpu.dot_dimension_numbers<[1], [0], [0], [1], [0, 0, 1, 1], [], []>} : vector<2x32xf32>, vector<32x32xf32>, vector<2x32xf32> -> vector<2x32xf32>
    %215 = vector.broadcast %16 : vector<1x32xf32> to vector<2x32xf32>
    %216 = arith.addf %214, %215 : vector<2x32xf32>
    %cst_49 = arith.constant dense<0.000000e+00> : vector<2x32xf32>
    %217 = tpu.matmul %213, %14, %cst_49 {dimension_numbers = #tpu.dot_dimension_numbers<[1], [0], [0], [1], [0, 0, 1, 1], [], []>} : vector<2x32xf32>, vector<32x32xf32>, vector<2x32xf32> -> vector<2x32xf32>
    %218 = vector.broadcast %17 : vector<1x32xf32> to vector<2x32xf32>
    %219 = arith.addf %217, %218 : vector<2x32xf32>
    %cst_50 = arith.constant dense<0.000000e+00> : vector<2x4xf32>
    %220 = tpu.matmul %216, %18, %cst_50 {dimension_numbers = #tpu.dot_dimension_numbers<[1], [0], [0], [1], [0, 0, 1, 1], [], []>} : vector<2x32xf32>, vector<32x4xf32>, vector<2x4xf32> -> vector<2x4xf32>
    %cst_51 = arith.constant 0.176776692 : f32
    %221 = vector.broadcast %cst_51 : f32 to vector<2x4xf32>
    %222 = arith.mulf %220, %221 : vector<2x4xf32>
    %223 = arith.mulf %216, %219 : vector<2x32xf32>
    %cst_52 = arith.constant dense<0.000000e+00> : vector<2xf32>
    %224 = vector.multi_reduction <add>, %223, %cst_52 [1] : vector<2x32xf32> to vector<2xf32>
    %225 = vector.shape_cast %224 : vector<2xf32> to vector<2x1xf32>
    %cst_53 = arith.constant 0.176776692 : f32
    %226 = vector.broadcast %cst_53 : f32 to vector<2x1xf32>
    %227 = arith.mulf %225, %226 : vector<2x1xf32>
    %cst_54 = arith.constant dense<0xFF800000> : vector<2xf32>
    %228 = vector.multi_reduction <maximumf>, %222, %cst_54 [1] : vector<2x4xf32> to vector<2xf32>
    %229 = vector.shape_cast %228 : vector<2xf32> to vector<2x1xf32>
    %230 = arith.maximumf %229, %227 : vector<2x1xf32>
    %231 = vector.broadcast %230 : vector<2x1xf32> to vector<2x4xf32>
    %232 = arith.subf %222, %231 : vector<2x4xf32>
    %233 = math.exp %232 : vector<2x4xf32>
    %234 = arith.subf %227, %230 : vector<2x1xf32>
    %235 = math.exp %234 : vector<2x1xf32>
    %cst_55 = arith.constant dense<0.000000e+00> : vector<2xf32>
    %236 = vector.multi_reduction <add>, %233, %cst_55 [1] : vector<2x4xf32> to vector<2xf32>
    %237 = vector.shape_cast %236 : vector<2xf32> to vector<2x1xf32>
    %238 = arith.addf %237, %235 : vector<2x1xf32>
    %cst_56 = arith.constant 1.000000e+00 : f32
    %239 = vector.broadcast %cst_56 : f32 to vector<2x1xf32>
    %240 = arith.divf %239, %238 : vector<2x1xf32>
    %241 = vector.broadcast %240 : vector<2x1xf32> to vector<2x4xf32>
    %242 = arith.mulf %233, %241 : vector<2x4xf32>
    %243 = arith.mulf %235, %240 : vector<2x1xf32>
    %244 = math.log %238 : vector<2x1xf32>
    %245 = vector.broadcast %230 : vector<2x1xf32> to vector<2x4xf32>
    %246 = arith.subf %222, %245 : vector<2x4xf32>
    %247 = arith.mulf %233, %246 : vector<2x4xf32>
    %cst_57 = arith.constant dense<0.000000e+00> : vector<2xf32>
    %248 = vector.multi_reduction <add>, %247, %cst_57 [1] : vector<2x4xf32> to vector<2xf32>
    %249 = vector.shape_cast %248 : vector<2xf32> to vector<2x1xf32>
    %250 = arith.subf %227, %230 : vector<2x1xf32>
    %251 = arith.mulf %235, %250 : vector<2x1xf32>
    %252 = arith.addf %249, %251 : vector<2x1xf32>
    %253 = arith.mulf %252, %240 : vector<2x1xf32>
    %254 = arith.subf %244, %253 : vector<2x1xf32>
    %cst_58 = arith.constant dense<0.000000e+00> : vector<2x32xf32>
    %255 = tpu.matmul %242, %1, %cst_58 {dimension_numbers = #tpu.dot_dimension_numbers<[1], [0], [0], [1], [0, 0, 1, 1], [], []>} : vector<2x4xf32>, vector<4x32xf32>, vector<2x32xf32> -> vector<2x32xf32>
    %256 = vector.broadcast %243 : vector<2x1xf32> to vector<2x32xf32>
    %257 = arith.mulf %256, %213 : vector<2x32xf32>
    %258 = arith.addf %255, %257 : vector<2x32xf32>
    %c0_59 = arith.constant 0 : index
    %c5 = arith.constant 5 : index
    %259 = vector.load %arg3[%c0_59, %c5] : memref<2x128xf32, #tpu.memory_space<vmem>>, vector<2x1xf32>
    tpu.vector_store %arg3[%c0_59, %c5], %254 {strides = array<i32>} : memref<2x128xf32, #tpu.memory_space<vmem>>, vector<2x1xf32>,
    %260 = vector.extract_strided_slice %89 {offsets = [0, 0], sizes = [3, 32], strides = [1, 1]} : vector<4x32xf32> to vector<3x32xf32>
    %261 = vector.extract_strided_slice %89 {offsets = [1, 0], sizes = [3, 32], strides = [1, 1]} : vector<4x32xf32> to vector<3x32xf32>
    %262 = vector.broadcast %181 : vector<1x1xf32> to vector<3x1xf32>
    %263 = arith.cmpf olt, %169, %262 : vector<3x1xf32>
    %264 = vector.broadcast %181 : vector<1x1xf32> to vector<3x1xf32>
    %265 = arith.cmpf oeq, %169, %264 : vector<3x1xf32>
    %266 = vector.extract_strided_slice %258 {offsets = [0, 0], sizes = [1, 32], strides = [1, 1]} : vector<2x32xf32> to vector<1x32xf32>
    %267 = vector.shape_cast %265 : vector<3x1xi1> to vector<3x1xi1>
    %268 = vector.broadcast %267 : vector<3x1xi1> to vector<3x32xi1>
    %269 = vector.shape_cast %266 : vector<1x32xf32> to vector<1x32xf32>
    %270 = vector.broadcast %269 : vector<1x32xf32> to vector<3x32xf32>
    %271 = arith.select %268, %270, %261 : vector<3x32xi1>, vector<3x32xf32>
    %272 = vector.shape_cast %263 : vector<3x1xi1> to vector<3x1xi1>
    %273 = vector.broadcast %272 : vector<3x1xi1> to vector<3x32xi1>
    %274 = arith.select %273, %260, %271 : vector<3x32xi1>, vector<3x32xf32>
    %275 = vector.extract_strided_slice %90 {offsets = [0, 0], sizes = [3, 32], strides = [1, 1]} : vector<4x32xf32> to vector<3x32xf32>
    %276 = vector.extract_strided_slice %90 {offsets = [1, 0], sizes = [3, 32], strides = [1, 1]} : vector<4x32xf32> to vector<3x32xf32>
    %277 = vector.broadcast %204 : vector<1x1xf32> to vector<3x1xf32>
    %278 = arith.cmpf olt, %192, %277 : vector<3x1xf32>
    %279 = vector.broadcast %204 : vector<1x1xf32> to vector<3x1xf32>
    %280 = arith.cmpf oeq, %192, %279 : vector<3x1xf32>
    %281 = vector.extract_strided_slice %258 {offsets = [1, 0], sizes = [1, 32], strides = [1, 1]} : vector<2x32xf32> to vector<1x32xf32>
    %282 = vector.shape_cast %280 : vector<3x1xi1> to vector<3x1xi1>
    %283 = vector.broadcast %282 : vector<3x1xi1> to vector<3x32xi1>
    %284 = vector.shape_cast %281 : vector<1x32xf32> to vector<1x32xf32>
    %285 = vector.broadcast %284 : vector<1x32xf32> to vector<3x32xf32>
    %286 = arith.select %283, %285, %276 : vector<3x32xi1>, vector<3x32xf32>
    %287 = vector.shape_cast %278 : vector<3x1xi1> to vector<3x1xi1>
    %288 = vector.broadcast %287 : vector<3x1xi1> to vector<3x32xi1>
    %289 = arith.select %288, %275, %286 : vector<3x32xi1>, vector<3x32xf32>
    %290 = tpu.concatenate %274, %289 in 0 : vector<3x32xf32>, vector<3x32xf32> -> vector<6x32xf32>
    %cst_60 = arith.constant dense<0.000000e+00> : vector<6x96xf32>
    %291 = tpu.matmul %290, %2, %cst_60 {dimension_numbers = #tpu.dot_dimension_numbers<[1], [0], [0], [1], [0, 0, 1, 1], [], []>} : vector<6x32xf32>, vector<32x96xf32>, vector<6x96xf32> -> vector<6x96xf32>
    %292 = vector.broadcast %5 : vector<1x96xf32> to vector<6x96xf32>
    %293 = arith.addf %291, %292 : vector<6x96xf32>
    %294 = vector.extract_strided_slice %293 {offsets = [0, 0], sizes = [2, 96], strides = [1, 1]} : vector<6x96xf32> to vector<2x96xf32>
    %295 = vector.extract_strided_slice %293 {offsets = [3, 0], sizes = [2, 96], strides = [1, 1]} : vector<6x96xf32> to vector<2x96xf32>
    %296 = tpu.concatenate %294, %295 in 0 : vector<2x96xf32>, vector<2x96xf32> -> vector<4x96xf32>
    %297 = vector.extract_strided_slice %293 {offsets = [1, 0], sizes = [2, 96], strides = [1, 1]} : vector<6x96xf32> to vector<2x96xf32>
    %298 = vector.extract_strided_slice %293 {offsets = [4, 0], sizes = [2, 96], strides = [1, 1]} : vector<6x96xf32> to vector<2x96xf32>
    %299 = tpu.concatenate %297, %298 in 0 : vector<2x96xf32>, vector<2x96xf32> -> vector<4x96xf32>
    %300 = vector.extract_strided_slice %296 {offsets = [0, 0], sizes = [4, 32], strides = [1, 1]} : vector<4x96xf32> to vector<4x32xf32>
    %301 = vector.broadcast %7 : vector<1x32xf32> to vector<4x32xf32>
    %302 = arith.addf %300, %301 : vector<4x32xf32>
    %303 = arith.negf %302 : vector<4x32xf32>
    %304 = math.exp %303 : vector<4x32xf32>
    %cst_61 = arith.constant 1.000000e+00 : f32
    %305 = vector.broadcast %cst_61 : f32 to vector<4x32xf32>
    %306 = arith.addf %305, %304 : vector<4x32xf32>
    %307 = arith.divf %305, %306 : vector<4x32xf32>
    %308 = vector.extract_strided_slice %296 {offsets = [0, 32], sizes = [4, 32], strides = [1, 1]} : vector<4x96xf32> to vector<4x32xf32>
    %309 = vector.broadcast %8 : vector<1x32xf32> to vector<4x32xf32>
    %310 = arith.addf %308, %309 : vector<4x32xf32>
    %311 = arith.negf %310 : vector<4x32xf32>
    %312 = math.exp %311 : vector<4x32xf32>
    %cst_62 = arith.constant 1.000000e+00 : f32
    %313 = vector.broadcast %cst_62 : f32 to vector<4x32xf32>
    %314 = arith.addf %313, %312 : vector<4x32xf32>
    %315 = arith.divf %313, %314 : vector<4x32xf32>
    %316 = vector.extract_strided_slice %296 {offsets = [0, 64], sizes = [4, 32], strides = [1, 1]} : vector<4x96xf32> to vector<4x32xf32>
    %317 = vector.broadcast %9 : vector<1x32xf32> to vector<4x32xf32>
    %318 = arith.mulf %307, %317 : vector<4x32xf32>
    %319 = arith.addf %316, %318 : vector<4x32xf32>
    %320 = math.tanh %319 : vector<4x32xf32>
    %cst_63 = arith.constant 1.000000e+00 : f32
    %321 = vector.broadcast %cst_63 : f32 to vector<4x32xf32>
    %322 = arith.subf %321, %315 : vector<4x32xf32>
    %323 = arith.mulf %322, %320 : vector<4x32xf32>
    %cst_64 = arith.constant dense<0.000000e+00> : vector<4x96xf32>
    %324 = tpu.matmul %323, %3, %cst_64 {dimension_numbers = #tpu.dot_dimension_numbers<[1], [0], [0], [1], [0, 0, 1, 1], [], []>} : vector<4x32xf32>, vector<32x96xf32>, vector<4x96xf32> -> vector<4x96xf32>
    %325 = vector.broadcast %6 : vector<1x96xf32> to vector<4x96xf32>
    %326 = arith.addf %324, %325 : vector<4x96xf32>
    %327 = vector.extract_strided_slice %299 {offsets = [0, 0], sizes = [4, 32], strides = [1, 1]} : vector<4x96xf32> to vector<4x32xf32>
    %328 = vector.extract_strided_slice %326 {offsets = [0, 0], sizes = [4, 32], strides = [1, 1]} : vector<4x96xf32> to vector<4x32xf32>
    %329 = arith.addf %327, %328 : vector<4x32xf32>
    %330 = arith.negf %329 : vector<4x32xf32>
    %331 = math.exp %330 : vector<4x32xf32>
    %cst_65 = arith.constant 1.000000e+00 : f32
    %332 = vector.broadcast %cst_65 : f32 to vector<4x32xf32>
    %333 = arith.addf %332, %331 : vector<4x32xf32>
    %334 = arith.divf %332, %333 : vector<4x32xf32>
    %335 = vector.extract_strided_slice %299 {offsets = [0, 32], sizes = [4, 32], strides = [1, 1]} : vector<4x96xf32> to vector<4x32xf32>
    %336 = vector.extract_strided_slice %326 {offsets = [0, 32], sizes = [4, 32], strides = [1, 1]} : vector<4x96xf32> to vector<4x32xf32>
    %337 = arith.addf %335, %336 : vector<4x32xf32>
    %338 = arith.negf %337 : vector<4x32xf32>
    %339 = math.exp %338 : vector<4x32xf32>
    %cst_66 = arith.constant 1.000000e+00 : f32
    %340 = vector.broadcast %cst_66 : f32 to vector<4x32xf32>
    %341 = arith.addf %340, %339 : vector<4x32xf32>
    %342 = arith.divf %340, %341 : vector<4x32xf32>
    %343 = vector.extract_strided_slice %299 {offsets = [0, 64], sizes = [4, 32], strides = [1, 1]} : vector<4x96xf32> to vector<4x32xf32>
    %344 = vector.extract_strided_slice %326 {offsets = [0, 64], sizes = [4, 32], strides = [1, 1]} : vector<4x96xf32> to vector<4x32xf32>
    %345 = arith.mulf %334, %344 : vector<4x32xf32>
    %346 = arith.addf %343, %345 : vector<4x32xf32>
    %347 = math.tanh %346 : vector<4x32xf32>
    %cst_67 = arith.constant 1.000000e+00 : f32
    %348 = vector.broadcast %cst_67 : f32 to vector<4x32xf32>
    %349 = arith.subf %348, %342 : vector<4x32xf32>
    %350 = arith.mulf %349, %347 : vector<4x32xf32>
    %351 = arith.mulf %342, %323 : vector<4x32xf32>
    %352 = arith.addf %350, %351 : vector<4x32xf32>
    %353 = vector.extract_strided_slice %352 {offsets = [0, 0], sizes = [2, 32], strides = [1, 1]} : vector<4x32xf32> to vector<2x32xf32>
    %354 = vector.extract_strided_slice %352 {offsets = [2, 0], sizes = [2, 32], strides = [1, 1]} : vector<4x32xf32> to vector<2x32xf32>
    %355 = vector.broadcast %11 : vector<1x32xf32> to vector<4x32xf32>
    %356 = arith.mulf %352, %355 : vector<4x32xf32>
    %cst_68 = arith.constant dense<0.000000e+00> : vector<4xf32>
    %357 = vector.multi_reduction <add>, %356, %cst_68 [1] : vector<4x32xf32> to vector<4xf32>
    %358 = vector.shape_cast %357 : vector<4xf32> to vector<4x1xf32>
    %359 = vector.broadcast %12 : vector<1x1xf32> to vector<4x1xf32>
    %360 = arith.addf %358, %359 : vector<4x1xf32>
    %361 = arith.negf %360 : vector<4x1xf32>
    %362 = math.exp %361 : vector<4x1xf32>
    %cst_69 = arith.constant 1.000000e+00 : f32
    %363 = vector.broadcast %cst_69 : f32 to vector<4x1xf32>
    %364 = arith.addf %363, %362 : vector<4x1xf32>
    %365 = arith.divf %363, %364 : vector<4x1xf32>
    %366 = vector.extract_strided_slice %365 {offsets = [0, 0], sizes = [2, 1], strides = [1, 1]} : vector<4x1xf32> to vector<2x1xf32>
    %367 = tpu.iota {dimensions = array<i32: 0>} : vector<2x1xi32>
    %368 = arith.sitofp %367 : vector<2x1xi32> to vector<2x1xf32>
    %cst_70 = arith.constant dense<0xFF800000> : vector<1xf32>
    %369 = vector.multi_reduction <maximumf>, %366, %cst_70 [0] : vector<2x1xf32> to vector<1xf32>
    %370 = vector.shape_cast %369 : vector<1xf32> to vector<1x1xf32>
    %371 = vector.broadcast %370 : vector<1x1xf32> to vector<2x1xf32>
    %372 = arith.cmpf oge, %366, %371 : vector<2x1xf32>
    %cst_71 = arith.constant 0.000000e+00 : f32
    %373 = vector.broadcast %cst_71 : f32 to vector<2x1xf32>
    %374 = arith.subf %373, %368 : vector<2x1xf32>
    %cst_72 = arith.constant -2.000000e+00 : f32
    %375 = vector.broadcast %cst_72 : f32 to vector<2x1xf32>
    %376 = arith.select %372, %374, %375 : vector<2x1xi1>, vector<2x1xf32>
    %cst_73 = arith.constant dense<0xFF800000> : vector<1xf32>
    %377 = vector.multi_reduction <maximumf>, %376, %cst_73 [0] : vector<2x1xf32> to vector<1xf32>
    %378 = vector.shape_cast %377 : vector<1xf32> to vector<1x1xf32>
    %cst_74 = arith.constant 0.000000e+00 : f32
    %379 = vector.broadcast %cst_74 : f32 to vector<1x1xf32>
    %380 = arith.subf %379, %378 : vector<1x1xf32>
    %381 = vector.broadcast %380 : vector<1x1xf32> to vector<2x1xf32>
    %382 = arith.cmpf oeq, %368, %381 : vector<2x1xf32>
    %383 = arith.extui %382 : vector<2x1xi1> to vector<2x1xi32>
    %384 = arith.sitofp %383 : vector<2x1xi32> to vector<2x1xf32>
    %385 = vector.broadcast %384 : vector<2x1xf32> to vector<2x32xf32>
    %386 = arith.mulf %353, %385 : vector<2x32xf32>
    %cst_75 = arith.constant dense<0.000000e+00> : vector<32xf32>
    %387 = vector.multi_reduction <add>, %386, %cst_75 [0] : vector<2x32xf32> to vector<32xf32>
    %388 = vector.shape_cast %387 : vector<32xf32> to vector<1x32xf32>
    %389 = vector.extract_strided_slice %365 {offsets = [2, 0], sizes = [2, 1], strides = [1, 1]} : vector<4x1xf32> to vector<2x1xf32>
    %390 = tpu.iota {dimensions = array<i32: 0>} : vector<2x1xi32>
    %391 = arith.sitofp %390 : vector<2x1xi32> to vector<2x1xf32>
    %cst_76 = arith.constant dense<0xFF800000> : vector<1xf32>
    %392 = vector.multi_reduction <maximumf>, %389, %cst_76 [0] : vector<2x1xf32> to vector<1xf32>
    %393 = vector.shape_cast %392 : vector<1xf32> to vector<1x1xf32>
    %394 = vector.broadcast %393 : vector<1x1xf32> to vector<2x1xf32>
    %395 = arith.cmpf oge, %389, %394 : vector<2x1xf32>
    %cst_77 = arith.constant 0.000000e+00 : f32
    %396 = vector.broadcast %cst_77 : f32 to vector<2x1xf32>
    %397 = arith.subf %396, %391 : vector<2x1xf32>
    %cst_78 = arith.constant -2.000000e+00 : f32
    %398 = vector.broadcast %cst_78 : f32 to vector<2x1xf32>
    %399 = arith.select %395, %397, %398 : vector<2x1xi1>, vector<2x1xf32>
    %cst_79 = arith.constant dense<0xFF800000> : vector<1xf32>
    %400 = vector.multi_reduction <maximumf>, %399, %cst_79 [0] : vector<2x1xf32> to vector<1xf32>
    %401 = vector.shape_cast %400 : vector<1xf32> to vector<1x1xf32>
    %cst_80 = arith.constant 0.000000e+00 : f32
    %402 = vector.broadcast %cst_80 : f32 to vector<1x1xf32>
    %403 = arith.subf %402, %401 : vector<1x1xf32>
    %404 = vector.broadcast %403 : vector<1x1xf32> to vector<2x1xf32>
    %405 = arith.cmpf oeq, %391, %404 : vector<2x1xf32>
    %406 = arith.extui %405 : vector<2x1xi1> to vector<2x1xi32>
    %407 = arith.sitofp %406 : vector<2x1xi32> to vector<2x1xf32>
    %408 = vector.broadcast %407 : vector<2x1xf32> to vector<2x32xf32>
    %409 = arith.mulf %354, %408 : vector<2x32xf32>
    %cst_81 = arith.constant dense<0.000000e+00> : vector<32xf32>
    %410 = vector.multi_reduction <add>, %409, %cst_81 [0] : vector<2x32xf32> to vector<32xf32>
    %411 = vector.shape_cast %410 : vector<32xf32> to vector<1x32xf32>
    %412 = tpu.concatenate %388, %411 in 0 : vector<1x32xf32>, vector<1x32xf32> -> vector<2x32xf32>
    %cst_82 = arith.constant dense<0.000000e+00> : vector<2x32xf32>
    %413 = tpu.matmul %412, %13, %cst_82 {dimension_numbers = #tpu.dot_dimension_numbers<[1], [0], [0], [1], [0, 0, 1, 1], [], []>} : vector<2x32xf32>, vector<32x32xf32>, vector<2x32xf32> -> vector<2x32xf32>
    %414 = vector.broadcast %16 : vector<1x32xf32> to vector<2x32xf32>
    %415 = arith.addf %413, %414 : vector<2x32xf32>
    %cst_83 = arith.constant dense<0.000000e+00> : vector<2x32xf32>
    %416 = tpu.matmul %412, %14, %cst_83 {dimension_numbers = #tpu.dot_dimension_numbers<[1], [0], [0], [1], [0, 0, 1, 1], [], []>} : vector<2x32xf32>, vector<32x32xf32>, vector<2x32xf32> -> vector<2x32xf32>
    %417 = vector.broadcast %17 : vector<1x32xf32> to vector<2x32xf32>
    %418 = arith.addf %416, %417 : vector<2x32xf32>
    %cst_84 = arith.constant dense<0.000000e+00> : vector<2x4xf32>
    %419 = tpu.matmul %415, %18, %cst_84 {dimension_numbers = #tpu.dot_dimension_numbers<[1], [0], [0], [1], [0, 0, 1, 1], [], []>} : vector<2x32xf32>, vector<32x4xf32>, vector<2x4xf32> -> vector<2x4xf32>
    %cst_85 = arith.constant 0.176776692 : f32
    %420 = vector.broadcast %cst_85 : f32 to vector<2x4xf32>
    %421 = arith.mulf %419, %420 : vector<2x4xf32>
    %422 = arith.mulf %415, %418 : vector<2x32xf32>
    %cst_86 = arith.constant dense<0.000000e+00> : vector<2xf32>
    %423 = vector.multi_reduction <add>, %422, %cst_86 [1] : vector<2x32xf32> to vector<2xf32>
    %424 = vector.shape_cast %423 : vector<2xf32> to vector<2x1xf32>
    %cst_87 = arith.constant 0.176776692 : f32
    %425 = vector.broadcast %cst_87 : f32 to vector<2x1xf32>
    %426 = arith.mulf %424, %425 : vector<2x1xf32>
    %cst_88 = arith.constant dense<0xFF800000> : vector<2xf32>
    %427 = vector.multi_reduction <maximumf>, %421, %cst_88 [1] : vector<2x4xf32> to vector<2xf32>
    %428 = vector.shape_cast %427 : vector<2xf32> to vector<2x1xf32>
    %429 = arith.maximumf %428, %426 : vector<2x1xf32>
    %430 = vector.broadcast %429 : vector<2x1xf32> to vector<2x4xf32>
    %431 = arith.subf %421, %430 : vector<2x4xf32>
    %432 = math.exp %431 : vector<2x4xf32>
    %433 = arith.subf %426, %429 : vector<2x1xf32>
    %434 = math.exp %433 : vector<2x1xf32>
    %cst_89 = arith.constant dense<0.000000e+00> : vector<2xf32>
    %435 = vector.multi_reduction <add>, %432, %cst_89 [1] : vector<2x4xf32> to vector<2xf32>
    %436 = vector.shape_cast %435 : vector<2xf32> to vector<2x1xf32>
    %437 = arith.addf %436, %434 : vector<2x1xf32>
    %cst_90 = arith.constant 1.000000e+00 : f32
    %438 = vector.broadcast %cst_90 : f32 to vector<2x1xf32>
    %439 = arith.divf %438, %437 : vector<2x1xf32>
    %440 = vector.broadcast %439 : vector<2x1xf32> to vector<2x4xf32>
    %441 = arith.mulf %432, %440 : vector<2x4xf32>
    %442 = arith.mulf %434, %439 : vector<2x1xf32>
    %443 = math.log %437 : vector<2x1xf32>
    %444 = vector.broadcast %429 : vector<2x1xf32> to vector<2x4xf32>
    %445 = arith.subf %421, %444 : vector<2x4xf32>
    %446 = arith.mulf %432, %445 : vector<2x4xf32>
    %cst_91 = arith.constant dense<0.000000e+00> : vector<2xf32>
    %447 = vector.multi_reduction <add>, %446, %cst_91 [1] : vector<2x4xf32> to vector<2xf32>
    %448 = vector.shape_cast %447 : vector<2xf32> to vector<2x1xf32>
    %449 = arith.subf %426, %429 : vector<2x1xf32>
    %450 = arith.mulf %434, %449 : vector<2x1xf32>
    %451 = arith.addf %448, %450 : vector<2x1xf32>
    %452 = arith.mulf %451, %439 : vector<2x1xf32>
    %453 = arith.subf %443, %452 : vector<2x1xf32>
    %cst_92 = arith.constant dense<0.000000e+00> : vector<2x32xf32>
    %454 = tpu.matmul %441, %1, %cst_92 {dimension_numbers = #tpu.dot_dimension_numbers<[1], [0], [0], [1], [0, 0, 1, 1], [], []>} : vector<2x4xf32>, vector<4x32xf32>, vector<2x32xf32> -> vector<2x32xf32>
    %455 = vector.broadcast %442 : vector<2x1xf32> to vector<2x32xf32>
    %456 = arith.mulf %455, %412 : vector<2x32xf32>
    %457 = arith.addf %454, %456 : vector<2x32xf32>
    %c0_93 = arith.constant 0 : index
    %c6 = arith.constant 6 : index
    %458 = vector.load %arg3[%c0_93, %c6] : memref<2x128xf32, #tpu.memory_space<vmem>>, vector<2x1xf32>
    tpu.vector_store %arg3[%c0_93, %c6], %453 {strides = array<i32>} : memref<2x128xf32, #tpu.memory_space<vmem>>, vector<2x1xf32>,
    %459 = vector.extract_strided_slice %274 {offsets = [0, 0], sizes = [2, 32], strides = [1, 1]} : vector<3x32xf32> to vector<2x32xf32>
    %460 = vector.extract_strided_slice %274 {offsets = [1, 0], sizes = [2, 32], strides = [1, 1]} : vector<3x32xf32> to vector<2x32xf32>
    %461 = vector.broadcast %380 : vector<1x1xf32> to vector<2x1xf32>
    %462 = arith.cmpf olt, %368, %461 : vector<2x1xf32>
    %463 = vector.broadcast %380 : vector<1x1xf32> to vector<2x1xf32>
    %464 = arith.cmpf oeq, %368, %463 : vector<2x1xf32>
    %465 = vector.extract_strided_slice %457 {offsets = [0, 0], sizes = [1, 32], strides = [1, 1]} : vector<2x32xf32> to vector<1x32xf32>
    %466 = vector.shape_cast %464 : vector<2x1xi1> to vector<2x1xi1>
    %467 = vector.broadcast %466 : vector<2x1xi1> to vector<2x32xi1>
    %468 = vector.shape_cast %465 : vector<1x32xf32> to vector<1x32xf32>
    %469 = vector.broadcast %468 : vector<1x32xf32> to vector<2x32xf32>
    %470 = arith.select %467, %469, %460 : vector<2x32xi1>, vector<2x32xf32>
    %471 = vector.shape_cast %462 : vector<2x1xi1> to vector<2x1xi1>
    %472 = vector.broadcast %471 : vector<2x1xi1> to vector<2x32xi1>
    %473 = arith.select %472, %459, %470 : vector<2x32xi1>, vector<2x32xf32>
    %474 = vector.extract_strided_slice %289 {offsets = [0, 0], sizes = [2, 32], strides = [1, 1]} : vector<3x32xf32> to vector<2x32xf32>
    %475 = vector.extract_strided_slice %289 {offsets = [1, 0], sizes = [2, 32], strides = [1, 1]} : vector<3x32xf32> to vector<2x32xf32>
    %476 = vector.broadcast %403 : vector<1x1xf32> to vector<2x1xf32>
    %477 = arith.cmpf olt, %391, %476 : vector<2x1xf32>
    %478 = vector.broadcast %403 : vector<1x1xf32> to vector<2x1xf32>
    %479 = arith.cmpf oeq, %391, %478 : vector<2x1xf32>
    %480 = vector.extract_strided_slice %457 {offsets = [1, 0], sizes = [1, 32], strides = [1, 1]} : vector<2x32xf32> to vector<1x32xf32>
    %481 = vector.shape_cast %479 : vector<2x1xi1> to vector<2x1xi1>
    %482 = vector.broadcast %481 : vector<2x1xi1> to vector<2x32xi1>
    %483 = vector.shape_cast %480 : vector<1x32xf32> to vector<1x32xf32>
    %484 = vector.broadcast %483 : vector<1x32xf32> to vector<2x32xf32>
    %485 = arith.select %482, %484, %475 : vector<2x32xi1>, vector<2x32xf32>
    %486 = vector.shape_cast %477 : vector<2x1xi1> to vector<2x1xi1>
    %487 = vector.broadcast %486 : vector<2x1xi1> to vector<2x32xi1>
    %488 = arith.select %487, %474, %485 : vector<2x32xi1>, vector<2x32xf32>
    %489 = tpu.concatenate %473, %488 in 0 : vector<2x32xf32>, vector<2x32xf32> -> vector<4x32xf32>
    %cst_94 = arith.constant dense<0.000000e+00> : vector<4x96xf32>
    %490 = tpu.matmul %489, %2, %cst_94 {dimension_numbers = #tpu.dot_dimension_numbers<[1], [0], [0], [1], [0, 0, 1, 1], [], []>} : vector<4x32xf32>, vector<32x96xf32>, vector<4x96xf32> -> vector<4x96xf32>
    %491 = vector.broadcast %5 : vector<1x96xf32> to vector<4x96xf32>
    %492 = arith.addf %490, %491 : vector<4x96xf32>
    %493 = vector.extract_strided_slice %492 {offsets = [0, 0], sizes = [1, 96], strides = [1, 1]} : vector<4x96xf32> to vector<1x96xf32>
    %494 = vector.extract_strided_slice %492 {offsets = [2, 0], sizes = [1, 96], strides = [1, 1]} : vector<4x96xf32> to vector<1x96xf32>
    %495 = tpu.concatenate %493, %494 in 0 : vector<1x96xf32>, vector<1x96xf32> -> vector<2x96xf32>
    %496 = vector.extract_strided_slice %492 {offsets = [1, 0], sizes = [1, 96], strides = [1, 1]} : vector<4x96xf32> to vector<1x96xf32>
    %497 = vector.extract_strided_slice %492 {offsets = [3, 0], sizes = [1, 96], strides = [1, 1]} : vector<4x96xf32> to vector<1x96xf32>
    %498 = tpu.concatenate %496, %497 in 0 : vector<1x96xf32>, vector<1x96xf32> -> vector<2x96xf32>
    %499 = vector.extract_strided_slice %495 {offsets = [0, 0], sizes = [2, 32], strides = [1, 1]} : vector<2x96xf32> to vector<2x32xf32>
    %500 = vector.broadcast %7 : vector<1x32xf32> to vector<2x32xf32>
    %501 = arith.addf %499, %500 : vector<2x32xf32>
    %502 = arith.negf %501 : vector<2x32xf32>
    %503 = math.exp %502 : vector<2x32xf32>
    %cst_95 = arith.constant 1.000000e+00 : f32
    %504 = vector.broadcast %cst_95 : f32 to vector<2x32xf32>
    %505 = arith.addf %504, %503 : vector<2x32xf32>
    %506 = arith.divf %504, %505 : vector<2x32xf32>
    %507 = vector.extract_strided_slice %495 {offsets = [0, 32], sizes = [2, 32], strides = [1, 1]} : vector<2x96xf32> to vector<2x32xf32>
    %508 = vector.broadcast %8 : vector<1x32xf32> to vector<2x32xf32>
    %509 = arith.addf %507, %508 : vector<2x32xf32>
    %510 = arith.negf %509 : vector<2x32xf32>
    %511 = math.exp %510 : vector<2x32xf32>
    %cst_96 = arith.constant 1.000000e+00 : f32
    %512 = vector.broadcast %cst_96 : f32 to vector<2x32xf32>
    %513 = arith.addf %512, %511 : vector<2x32xf32>
    %514 = arith.divf %512, %513 : vector<2x32xf32>
    %515 = vector.extract_strided_slice %495 {offsets = [0, 64], sizes = [2, 32], strides = [1, 1]} : vector<2x96xf32> to vector<2x32xf32>
    %516 = vector.broadcast %9 : vector<1x32xf32> to vector<2x32xf32>
    %517 = arith.mulf %506, %516 : vector<2x32xf32>
    %518 = arith.addf %515, %517 : vector<2x32xf32>
    %519 = math.tanh %518 : vector<2x32xf32>
    %cst_97 = arith.constant 1.000000e+00 : f32
    %520 = vector.broadcast %cst_97 : f32 to vector<2x32xf32>
    %521 = arith.subf %520, %514 : vector<2x32xf32>
    %522 = arith.mulf %521, %519 : vector<2x32xf32>
    %cst_98 = arith.constant dense<0.000000e+00> : vector<2x96xf32>
    %523 = tpu.matmul %522, %3, %cst_98 {dimension_numbers = #tpu.dot_dimension_numbers<[1], [0], [0], [1], [0, 0, 1, 1], [], []>} : vector<2x32xf32>, vector<32x96xf32>, vector<2x96xf32> -> vector<2x96xf32>
    %524 = vector.broadcast %6 : vector<1x96xf32> to vector<2x96xf32>
    %525 = arith.addf %523, %524 : vector<2x96xf32>
    %526 = vector.extract_strided_slice %498 {offsets = [0, 0], sizes = [2, 32], strides = [1, 1]} : vector<2x96xf32> to vector<2x32xf32>
    %527 = vector.extract_strided_slice %525 {offsets = [0, 0], sizes = [2, 32], strides = [1, 1]} : vector<2x96xf32> to vector<2x32xf32>
    %528 = arith.addf %526, %527 : vector<2x32xf32>
    %529 = arith.negf %528 : vector<2x32xf32>
    %530 = math.exp %529 : vector<2x32xf32>
    %cst_99 = arith.constant 1.000000e+00 : f32
    %531 = vector.broadcast %cst_99 : f32 to vector<2x32xf32>
    %532 = arith.addf %531, %530 : vector<2x32xf32>
    %533 = arith.divf %531, %532 : vector<2x32xf32>
    %534 = vector.extract_strided_slice %498 {offsets = [0, 32], sizes = [2, 32], strides = [1, 1]} : vector<2x96xf32> to vector<2x32xf32>
    %535 = vector.extract_strided_slice %525 {offsets = [0, 32], sizes = [2, 32], strides = [1, 1]} : vector<2x96xf32> to vector<2x32xf32>
    %536 = arith.addf %534, %535 : vector<2x32xf32>
    %537 = arith.negf %536 : vector<2x32xf32>
    %538 = math.exp %537 : vector<2x32xf32>
    %cst_100 = arith.constant 1.000000e+00 : f32
    %539 = vector.broadcast %cst_100 : f32 to vector<2x32xf32>
    %540 = arith.addf %539, %538 : vector<2x32xf32>
    %541 = arith.divf %539, %540 : vector<2x32xf32>
    %542 = vector.extract_strided_slice %498 {offsets = [0, 64], sizes = [2, 32], strides = [1, 1]} : vector<2x96xf32> to vector<2x32xf32>
    %543 = vector.extract_strided_slice %525 {offsets = [0, 64], sizes = [2, 32], strides = [1, 1]} : vector<2x96xf32> to vector<2x32xf32>
    %544 = arith.mulf %533, %543 : vector<2x32xf32>
    %545 = arith.addf %542, %544 : vector<2x32xf32>
    %546 = math.tanh %545 : vector<2x32xf32>
    %cst_101 = arith.constant 1.000000e+00 : f32
    %547 = vector.broadcast %cst_101 : f32 to vector<2x32xf32>
    %548 = arith.subf %547, %541 : vector<2x32xf32>
    %549 = arith.mulf %548, %546 : vector<2x32xf32>
    %550 = arith.mulf %541, %522 : vector<2x32xf32>
    %551 = arith.addf %549, %550 : vector<2x32xf32>
    %552 = vector.extract_strided_slice %551 {offsets = [0, 0], sizes = [1, 32], strides = [1, 1]} : vector<2x32xf32> to vector<1x32xf32>
    %553 = vector.extract_strided_slice %551 {offsets = [1, 0], sizes = [1, 32], strides = [1, 1]} : vector<2x32xf32> to vector<1x32xf32>
    %554 = tpu.concatenate %552, %553 in 0 : vector<1x32xf32>, vector<1x32xf32> -> vector<2x32xf32>
    %cst_102 = arith.constant dense<0.000000e+00> : vector<2x32xf32>
    %555 = tpu.matmul %554, %13, %cst_102 {dimension_numbers = #tpu.dot_dimension_numbers<[1], [0], [0], [1], [0, 0, 1, 1], [], []>} : vector<2x32xf32>, vector<32x32xf32>, vector<2x32xf32> -> vector<2x32xf32>
    %556 = vector.broadcast %16 : vector<1x32xf32> to vector<2x32xf32>
    %557 = arith.addf %555, %556 : vector<2x32xf32>
    %cst_103 = arith.constant dense<0.000000e+00> : vector<2x32xf32>
    %558 = tpu.matmul %554, %14, %cst_103 {dimension_numbers = #tpu.dot_dimension_numbers<[1], [0], [0], [1], [0, 0, 1, 1], [], []>} : vector<2x32xf32>, vector<32x32xf32>, vector<2x32xf32> -> vector<2x32xf32>
    %559 = vector.broadcast %17 : vector<1x32xf32> to vector<2x32xf32>
    %560 = arith.addf %558, %559 : vector<2x32xf32>
    %cst_104 = arith.constant dense<0.000000e+00> : vector<2x4xf32>
    %561 = tpu.matmul %557, %18, %cst_104 {dimension_numbers = #tpu.dot_dimension_numbers<[1], [0], [0], [1], [0, 0, 1, 1], [], []>} : vector<2x32xf32>, vector<32x4xf32>, vector<2x4xf32> -> vector<2x4xf32>
    %cst_105 = arith.constant 0.176776692 : f32
    %562 = vector.broadcast %cst_105 : f32 to vector<2x4xf32>
    %563 = arith.mulf %561, %562 : vector<2x4xf32>
    %564 = arith.mulf %557, %560 : vector<2x32xf32>
    %cst_106 = arith.constant dense<0.000000e+00> : vector<2xf32>
    %565 = vector.multi_reduction <add>, %564, %cst_106 [1] : vector<2x32xf32> to vector<2xf32>
    %566 = vector.shape_cast %565 : vector<2xf32> to vector<2x1xf32>
    %cst_107 = arith.constant 0.176776692 : f32
    %567 = vector.broadcast %cst_107 : f32 to vector<2x1xf32>
    %568 = arith.mulf %566, %567 : vector<2x1xf32>
    %cst_108 = arith.constant dense<0xFF800000> : vector<2xf32>
    %569 = vector.multi_reduction <maximumf>, %563, %cst_108 [1] : vector<2x4xf32> to vector<2xf32>
    %570 = vector.shape_cast %569 : vector<2xf32> to vector<2x1xf32>
    %571 = arith.maximumf %570, %568 : vector<2x1xf32>
    %572 = vector.broadcast %571 : vector<2x1xf32> to vector<2x4xf32>
    %573 = arith.subf %563, %572 : vector<2x4xf32>
    %574 = math.exp %573 : vector<2x4xf32>
    %575 = arith.subf %568, %571 : vector<2x1xf32>
    %576 = math.exp %575 : vector<2x1xf32>
    %cst_109 = arith.constant dense<0.000000e+00> : vector<2xf32>
    %577 = vector.multi_reduction <add>, %574, %cst_109 [1] : vector<2x4xf32> to vector<2xf32>
    %578 = vector.shape_cast %577 : vector<2xf32> to vector<2x1xf32>
    %579 = arith.addf %578, %576 : vector<2x1xf32>
    %cst_110 = arith.constant 1.000000e+00 : f32
    %580 = vector.broadcast %cst_110 : f32 to vector<2x1xf32>
    %581 = arith.divf %580, %579 : vector<2x1xf32>
    %582 = math.log %579 : vector<2x1xf32>
    %583 = vector.broadcast %571 : vector<2x1xf32> to vector<2x4xf32>
    %584 = arith.subf %563, %583 : vector<2x4xf32>
    %585 = arith.mulf %574, %584 : vector<2x4xf32>
    %cst_111 = arith.constant dense<0.000000e+00> : vector<2xf32>
    %586 = vector.multi_reduction <add>, %585, %cst_111 [1] : vector<2x4xf32> to vector<2xf32>
    %587 = vector.shape_cast %586 : vector<2xf32> to vector<2x1xf32>
    %588 = arith.subf %568, %571 : vector<2x1xf32>
    %589 = arith.mulf %576, %588 : vector<2x1xf32>
    %590 = arith.addf %587, %589 : vector<2x1xf32>
    %591 = arith.mulf %590, %581 : vector<2x1xf32>
    %592 = arith.subf %582, %591 : vector<2x1xf32>
    %c0_112 = arith.constant 0 : index
    %c0_113 = arith.constant 0 : index
    %593 = vector.load %arg3[%c0_112, %c0_113] : memref<2x128xf32, #tpu.memory_space<vmem>>, vector<2x4xf32>
    tpu.vector_store %arg3[%c0_112, %c0_113], %563 {strides = array<i32>} : memref<2x128xf32, #tpu.memory_space<vmem>>, vector<2x4xf32>,
    %c0_114 = arith.constant 0 : index
    %c4 = arith.constant 4 : index
    %594 = vector.load %arg3[%c0_114, %c4] : memref<2x128xf32, #tpu.memory_space<vmem>>, vector<2x1xf32>
    tpu.vector_store %arg3[%c0_114, %c4], %568 {strides = array<i32>} : memref<2x128xf32, #tpu.memory_space<vmem>>, vector<2x1xf32>,
    %c0_115 = arith.constant 0 : index
    %c8_116 = arith.constant 8 : index
    %595 = vector.load %arg3[%c0_115, %c8_116] : memref<2x128xf32, #tpu.memory_space<vmem>>, vector<2x1xf32>
    tpu.vector_store %arg3[%c0_115, %c8_116], %592 {strides = array<i32>} : memref<2x128xf32, #tpu.memory_space<vmem>>, vector<2x1xf32>,
    return
  }
  func.func @transform_0(%arg0: i32, %arg1: memref<2x4xi32, #tpu.memory_space<smem>>) -> (i32, i32) {
    %c0_i32 = arith.constant 0 : i32
    %c0_i32_0 = arith.constant 0 : i32
    %c0_i32_1 = arith.constant 0 : i32
    return %c0_i32, %c0_i32_0 : i32, i32
  }
  func.func @transform_1(%arg0: i32, %arg1: memref<2x4xi32, #tpu.memory_space<smem>>) -> (i32, i32) {
    %c0_i32 = arith.constant 0 : i32
    %c0_i32_0 = arith.constant 0 : i32
    %c0_i32_1 = arith.constant 0 : i32
    return %c0_i32, %c0_i32_0 : i32, i32
  }
}

</mosaic_0001>

<bundles_post_ra>
// kernel: encoder_forward.1
= control target key start
LH: loop header
LB: loop body
LE: loop exit
PB: predicated region body
PF: predicated region fallthrough
CT: control target
= control target key end

     0   :  { %s1417_s12 = smov [#allocation3]   ;;  %s1916_s0 = inlined_call_operand.hbm [shape: s32[2,4], index: 0, kind: input, shape index: {}]   ;;  %s1917_s1 = inlined_call_operand.hbm [shape: f32[192,128], index: 1, kind: input, shape index: {}]   ;;  %s1918_s2 = inlined_call_operand.vmem [shape: f32[2,128], index: 2, kind: output, shape index: {}]  }
   0x1   :  { %s8_s11 = sshll.u32 %s1916_s0, 4  ;;  %s9_s11 = int_to_ptr.hbm [resolvable:$true] %s8_s11 }
   0x2   :  { %11 = dma.hbm_to_smem %s9_s11, 32, %s1417_s12, [#allocation2] }
   0x3   :  { %1413 = dma.done.wait [#allocation2], 32 }
   0x4   :  { %1414 = vsyncadd [#allocation2], 4294967264 }
   0x5   :  { %14 = sfence }
   0x6   :  { %15 = vsyncpa [#allocation5], 0  ;;  %s20_s15 = sshll.u32 %s1917_s1, 4  ;;  %s1418_s16 = smov [#allocation4]   ;;  %s21_s15 = int_to_ptr.hbm [resolvable:$true] %s20_s15 }
   0x7   :  { %s22_s17 = sshll.u32 %s1418_s16, 4  ;;  %s1419_s18 = smov 128   ;;  %s23_s17 = int_to_ptr.vmem [resolvable:$true] %s22_s17 }
   0x8   :  { %s1420_s19 = smov 8  }
   0x9   :  { %28 = dma.hbm_to_vmem [thread:$0]  %s21_s15, 3072, %s23_s17, [#allocation5], %s1419_s18, %s1419_s18, %s1420_s19  }
   0xa   :  { %1415 = dma.done.wait [#allocation5], 3072  }
   0xb   :  { %1416 = vsyncadd [#allocation5], 4294964224  ;;  %v58_v0 = vlaneseq  ;;  %s63_s0 = sld [smem:[#allocation3]]  ;;  %v1421_v1 = vmov 0.0   ;;  %vm122_vm0 = vcmask 1044480   ;;  %v1469_v6 = vld [vmem:[#allocation4 + $0x20] sm:$0xff] }
   0xc   :  { %57 = vst [vmem:[%s1918_s2] sm:$0x3] %v1421_v1  ;;  %s1248_s1 = sld [smem:[#allocation3 + $0x1]]  ;;  %v1465_v4 = vld [vmem:[#allocation4] sm:$0x1f]  ;;  %v1471_v7 = vld [vmem:[#allocation4 + $0x18] sm:$0xff]  ;;  %163 = vmatpush.msra.mxu1 %v1469_v6  ;;  %v1481_v11 = vld [vmem:[#allocation4 + $0x10] sm:$0xff] }
   0xd   :  { %v1452_v2 = vshrl.u32 %v58_v0, 7  ;;  %s1250_s22 = sld [smem:[#allocation3 + $0x2]]  ;;  %v61_v3 = vand.u32 127, %v58_v0  ;;  %1262 = vmatpush.msk.msra.mxu0 %vm122_vm0, %v1465_v4  ;;  %v1513_v32 = vld [vmem:[#allocation4 + $0x8] sm:$0xff]  ;;  %s1422_s28 = smov 64   ;;  %v1537_v62 = vld [vmem:[#allocation4 + $0x40] sm:$0xff] }
   0xe   :  { %s1454_s23 = sld [smem:[#allocation3 + $0x3]]  ;;  %164 = vmatpush.msra.mxu1 %v1471_v7  ;;  %v42_v33 = vld [vmem:[#allocation4 + $0x48] sm:$0x3]  ;;  %s1423_s29 = smov 96   ;;  %v1539_v63 = vld [vmem:[#allocation4 + $0x38] sm:$0xff]  ;;  %234 = vmatpush.msra.mxu2 %v1537_v62  ;;  %v1542_v0 = vld [vmem:[#allocation4 + $0x30] sm:$0xff] }
   0xf   :  { %vm62_vm1 = vcmp.eq.s32.totalorder %v1452_v2, 0  ;;  %s1457_s24 = sld [smem:[#allocation3 + $0x80]]  ;;  %vm69_vm2 = vcmp.eq.s32.totalorder %v1452_v2, 1  ;;  %vm76_vm3 = vcmp.eq.s32.totalorder %v1452_v2, 2  ;;  %vm83_vm4 = vcmp.eq.s32.totalorder %v1452_v2, 3  ;;  %s1424_s30 = smov 32  }
  0x10   :  { %vm90_vm5 = vcmp.eq.s32.totalorder %v1452_v2, 4  ;;  %s1463_s25 = sld [smem:[#allocation3 + $0x81]]  ;;  %vm97_vm7 = vcmp.eq.s32.totalorder %v1452_v2, 5  ;;  %vm104_vm8 = vcmp.eq.s32.totalorder %v1452_v2, 6  ;;  %vm111_vm10 = vcmp.eq.s32.totalorder %v1452_v2, 7  ;;  %165 = vmatpush.msra.mxu1 %v1481_v11  ;;  %235 = vmatpush.msra.mxu2 %v1539_v63 }
  0x11   :  { %v64_v5 = vstv %s63_s0  ;;  %s1467_s26 = sld [smem:[#allocation3 + $0x82]]  ;;  %v1516_v34 = vperm.slane %v42_v33, 1  ;;  %v1524_v36 = vperm.slane %v42_v33, 0 }
  0x12   :  { %vm65_vm6 = vcmp.eq.s32.totalorder %v61_v3, %v64_v5  ;;  %v71_v8 = vstv %s1248_s1  ;;  %s1476_s27 = sld [smem:[#allocation3 + $0x83]]  ;;  %166 = vmatpush.msra.mxu1 %v1513_v32  ;;  %236 = vmatpush.msra.mxu2 %v1542_v0 }
  0x13   :  { %v1247_v9 = vsel %vm65_vm6, 1.0, %v1421_v1  ;;  %vm72_vm9 = vcmp.eq.s32.totalorder %v61_v3, %v71_v8  ;;  %v78_v10 = vstv %s1250_s22  ;;  %201 = vrot.lane.b32.xlu0 %v1516_v34, %s1422_s28 }
  0x14   :  { %v68_v12 = vsel %vm62_vm1, %v1247_v9, 0.0  ;;  %v1249_v13 = vsel %vm72_vm9, 1.0, %v1421_v1  ;;  %vm79_vm11 = vcmp.eq.s32.totalorder %v61_v3, %v78_v10  ;;  %v85_v14 = vstv %s1454_s23 }
  0x15   :  { %v75_v15 = vsel %vm69_vm2, %v1249_v13, %v68_v12  ;;  %v1251_v16 = vsel %vm79_vm11, 1.0, %v1421_v1  ;;  %vm86_vm12 = vcmp.eq.s32.totalorder %v61_v3, %v85_v14  ;;  %v92_v17 = vstv %s1457_s24 }
  0x16   :  { %v82_v18 = vsel %vm76_vm3, %v1251_v16, %v75_v15  ;;  %v1253_v19 = vsel %vm86_vm12, 1.0, %v1421_v1  ;;  %vm93_vm13 = vcmp.eq.s32.totalorder %v61_v3, %v92_v17  ;;  %v99_v20 = vstv %s1463_s25 }
  0x17   :  { %v89_v21 = vsel %vm83_vm4, %v1253_v19, %v82_v18  ;;  %v1255_v22 = vsel %vm93_vm13, 1.0, %v1421_v1  ;;  %vm100_vm14 = vcmp.eq.s32.totalorder %v61_v3, %v99_v20  ;;  %v106_v23 = vstv %s1467_s26 }
  0x18   :  { %v96_v24 = vsel %vm90_vm5, %v1255_v22, %v89_v21  ;;  %v1257_v25 = vsel %vm100_vm14, 1.0, %v1421_v1  ;;  %vm107_vm15 = vcmp.eq.s32.totalorder %v61_v3, %v106_v23  ;;  %v113_v26 = vstv %s1476_s27 }
  0x19   :  { %v103_v27 = vsel %vm97_vm7, %v1257_v25, %v96_v24  ;;  %v1259_v28 = vsel %vm107_vm15, 1.0, %v1421_v1  ;;  %vm114_vm0 = vcmp.eq.s32.totalorder %v61_v3, %v113_v26  ;;  %vm118_vm1 = vcmask 39936   ;;  %v1545_v3 = vld [vmem:[#allocation4 + $0x28] sm:$0xff] }
  0x1a   :  { %v110_v29 = vsel %vm104_vm8, %v1259_v28, %v103_v27  ;;  %v1261_v30 = vsel %vm114_vm0, 1.0, %v1421_v1  ;;  %vm147_vm2 = vcmask 261120   ;;  %vm174_vm3 = vcmask 1042432   ;;  %237 = vmatpush.msra.mxu2 %v1545_v3 }
  0x1b   :  { %v117_v31 = vsel %vm111_vm10, %v1261_v30, %v110_v29  ;;  %v1555_v30 = vld [vmem:[#allocation4 + $0x50] ss:$0 sm:$0xff]  ;;  %vm291_vm12 = vcmask 259072   ;;  %vm352_vm0 = vcmask 267523  }
  0x1c   :  { %1263 = vmatmul.msk.f32.vlgmr.msra.gmra.mxu0 %vm118_vm1, %v117_v31  ;;  %vm316_vm1 = vcmask 264448  }
  0x85   :  { %v1532_v54 = vpop.permute.xlu0 %201 }
  0x99   :  { %v1520_v35 = vpop.f32.mrf.mxu0 }
  0x9a   :  { %1264 = vmatmul.msk.f32.vlgmr.msra.gmra.mxu1 %vm147_vm2, %v1520_v35 }
 0x117   :  { %v168_v37 = vpop.f32.mrf.mxu1 }
 0x118   :  { %v169_v38 = vadd.f32 %v168_v37, %v1524_v36 }
 0x11a   :  { %v172_v39 = vrot.slane %v169_v38, 1  ;;  %v176_v40 = vrot.slane %v169_v38, 2 }
 0x11c   :  { %v175_v41 = vsel %vm174_vm3, %v169_v38, %v172_v39  ;;  %v1529_v42 = vsel %vm174_vm3, %v172_v39, %v176_v40 }
 0x11d   :  { %v180_v43 = vadd.f32 %v1516_v34, %v175_v41 }
 0x11f   :  { %v1265_v44 = vmul.f32 -1.442695, %v180_v43 }
 0x121   :  { %1309 = vpow2.f32 %v1265_v44 }
 0x127   :  { %v1310_v45 = vpop.eup %1309 }
 0x128   :  { %v184_v46 = vadd.f32 1.0, %v1310_v45 }
 0x12a   :  { %1311 = vrcp.f32 %v184_v46  ;;  %v196_v50 = vand.u32 2147483648, %v184_v46  ;;  %v194_v52 = vand.u32 2147483647, %v184_v46  ;;  %vm190_vm5 = vweird.f32 %v184_v46 }
 0x12c   :  { %v197_v55 = vor.u32 1.1754944e-38, %v196_v50  ;;  %vm195_vm7 = vcmp.eq.f32.partialorder %v194_v52, 8.507059e+37 }
 0x130   :  { %v1312_v47 = vpop.eup %1311 }
 0x131   :  { %v186_v48 = vmul.f32 %v1312_v47, %v184_v46  ;;  %vm191_vm4 = vweird.f32 %v1312_v47 }
 0x132   :  { %vm192_vm6 = vmor %vm190_vm5, %vm191_vm4 }
 0x133   :  { %v187_v49 = vsub.f32 1.0, %v186_v48 }
 0x135   :  { %v188_v51 = vmul.f32 %v1312_v47, %v187_v49 }
 0x137   :  { %v189_v53 = vadd.f32 %v1312_v47, %v188_v51 }
 0x139   :  { %v193_v56 = vsel %vm192_vm6, %v1312_v47, %v189_v53  ;;  %v1425_v47 = vmov 32  }
 0x13a   :  { %v198_v57 = vsel %vm195_vm7, %v197_v55, %v193_v56  ;;  %1306 = vset.pattern.permute.xlu2 %v1425_v47  ;;  %1305 = vset.pattern.permute.xlu1 %v1425_v47 }
 0x13b   :  { %v204_v58 = vmul.f32 %v1532_v54, %v198_v57  ;;  %v211_v5 = vsub.f32 1.0, %v198_v57  ;;  %1307 = vset.pattern.permute.xlu0 %v1425_v47 }
 0x13d   :  { %206 = vrot.lane.b32.xlu0 %v204_v58, %s1422_s28 }
 0x1af   :  { %v207_v59 = vpop.permute.xlu0 %206 }
 0x1b0   :  { %v209_v60 = vadd.f32 %v207_v59, %v175_v41 }
 0x1b2   :  { %1313 = vtanh.f32 %v209_v60 }
 0x1b8   :  { %v1314_v61 = vpop.eup %1313 }
 0x1b9   :  { %213 = vrot.lane.b32.xlu1 %v1314_v61, %s1423_s29 }
 0x22b   :  { %v214_v8 = vpop.permute.xlu1 %213 }
 0x22c   :  { %v216_v9 = vmul.f32 %v214_v8, %v211_v5 }
 0x22e   :  { %218 = vrot.lane.b32.xlu1 %v216_v9, %s1423_s29 }
 0x236   :  { %283 = vrot.lane.b32.xlu1 %v1555_v30, %s1424_s30 }
 0x2a0   :  { %v219_v10 = vpop.permute.xlu1 %218 }
 0x2a1   :  { %1266 = vmatmul.msk.f32.vlgmr.msra.gmra.mxu2 %vm147_vm2, %v219_v10 }
 0x2a8   :  { %v1560_v43 = vpop.permute.xlu1 %283 }
 0x324   :  { %v239_v12 = vpop.f32.mrf.mxu2 }
 0x325   :  { %v240_v13 = vadd.f32 %v239_v12, %v1516_v34 }
 0x327   :  { %263 = vrot.lane.b32.xlu2 %v240_v13, %s1422_s28  ;;  %v242_v14 = vadd.f32 %v240_v13, %v1529_v42 }
 0x329   :  { %v1267_v15 = vmul.f32 -1.442695, %v242_v14  ;;  %v1571_v14 = vcvt.s32.f32 %v1452_v2 }
 0x32b   :  { %1315 = vpow2.f32 %v1267_v15 }
 0x331   :  { %v1316_v16 = vpop.eup %1315 }
 0x332   :  { %v246_v17 = vadd.f32 1.0, %v1316_v16 }
 0x334   :  { %1317 = vrcp.f32 %v246_v17  ;;  %v258_v23 = vand.u32 2147483648, %v246_v17  ;;  %vm252_vm9 = vweird.f32 %v246_v17  ;;  %v256_v24 = vand.u32 2147483647, %v246_v17 }
 0x336   :  { %v259_v26 = vor.u32 1.1754944e-38, %v258_v23  ;;  %vm257_vm11 = vcmp.eq.f32.partialorder %v256_v24, 8.507059e+37 }
 0x33a   :  { %v1318_v18 = vpop.eup %1317 }
 0x33b   :  { %v248_v19 = vmul.f32 %v1318_v18, %v246_v17  ;;  %vm253_vm8 = vweird.f32 %v1318_v18 }
 0x33c   :  { %vm254_vm10 = vmor %vm252_vm9, %vm253_vm8  ;;  %vm344_vm9 = vcmask 518400  }
 0x33d   :  { %v249_v20 = vsub.f32 1.0, %v248_v19  ;;  %v1574_v19 = vsub.f32 0.0, %v1571_v14 }
 0x33f   :  { %v250_v21 = vmul.f32 %v1318_v18, %v249_v20  ;;  %v362_v24 = vrot.slane %v1574_v19, 5 }
 0x341   :  { %v251_v22 = vadd.f32 %v1318_v18, %v250_v21 }
 0x343   :  { %v255_v25 = vsel %vm254_vm10, %v1318_v18, %v251_v22  ;;  %vm393_vm10 = vcmask 1040384  }
 0x344   :  { %v260_v28 = vsel %vm257_vm11, %v259_v26, %v255_v25  ;;  %vm467_vm11 = vcmask 254976  }
 0x345   :  { %v273_v38 = vsub.f32 1.0, %v260_v28  ;;  %v279_v40 = vmul.f32 %v260_v28, %v216_v9 }
 0x381   :  { %v264_v27 = vpop.permute.xlu2 %263 }
 0x382   :  { %v266_v29 = vmul.f32 %v264_v27, %v260_v28 }
 0x384   :  { %268 = vrot.lane.b32.xlu2 %v266_v29, %s1422_s28 }
 0x3de   :  { %v269_v31 = vpop.permute.xlu2 %268 }
 0x3df   :  { %v271_v33 = vadd.f32 %v269_v31, %v1529_v42 }
 0x3e1   :  { %1319 = vtanh.f32 %v271_v33 }
 0x3e7   :  { %v1320_v37 = vpop.eup %1319 }
 0x3e8   :  { %275 = vrot.lane.b32.xlu0 %v1320_v37, %s1423_s29 }
 0x45a   :  { %v276_v39 = vpop.permute.xlu0 %275 }
 0x45b   :  { %v278_v41 = vmul.f32 %v276_v39, %v273_v38 }
 0x45d   :  { %v1562_v44 = vadd.f32 %v279_v40, %v278_v41 }
 0x45f   :  { %v286_v45 = vmul.f32 %v1560_v43, %v1562_v44 }
 0x461   :  { %288 = vrot.lane.b32.xlu2 %v286_v45, %s1423_s29 }
 0x4bb   :  { %v289_v46 = vpop.permute.xlu2 %288 }
 0x4bc   :  { %v292_v42 = vsel %vm291_vm12, %v289_v46, 0.0  ;;  %vm472_vm12 = vcmask 25600  }
 0x4bd   :  { %293 = vadd.xlane.f32.xlu0 %v292_v42 }
 0x530   :  { %v294_v48 = vpop.xlane.xlu0 %293 }
 0x531   :  { %v295_v49 = vadd.f32 %v1555_v30, %v294_v48 }
 0x533   :  { %v1268_v50 = vmul.f32 -1.442695, %v295_v49 }
 0x535   :  { %1321 = vpow2.f32 %v1268_v50 }
 0x53b   :  { %v1322_v51 = vpop.eup %1321 }
 0x53c   :  { %v299_v52 = vadd.f32 1.0, %v1322_v51 }
 0x53e   :  { %1323 = vrcp.f32 %v299_v52  ;;  %v311_v57 = vand.u32 2147483648, %v299_v52  ;;  %v309_v59 = vand.u32 2147483647, %v299_v52  ;;  %vm305_vm14 = vweird.f32 %v299_v52 }
 0x540   :  { %v312_v61 = vor.u32 1.1754944e-38, %v311_v57  ;;  %vm310_vm4 = vcmp.eq.f32.partialorder %v309_v59, 8.507059e+37  ;;  %v1606_v57 = vld [vmem:[#allocation4 + $0x70] sm:$0xff]  ;;  %v1610_v59 = vld [vmem:[#allocation4 + $0x68] sm:$0xff] }
 0x541   :  { %413 = vmatpush.msra.mxu3 %v1606_v57 }
 0x543   :  { %414 = vmatpush.msra.mxu3 %v1610_v59 }
 0x544   :  { %v1324_v53 = vpop.eup %1323 }
 0x545   :  { %v301_v55 = vmul.f32 %v1324_v53, %v299_v52  ;;  %vm306_vm13 = vweird.f32 %v1324_v53 }
 0x546   :  { %vm307_vm15 = vmor %vm305_vm14, %vm306_vm13  ;;  %vm523_vm14 = vcmask 1043456  }
 0x547   :  { %v302_v56 = vsub.f32 1.0, %v301_v55  ;;  %1274 = vmatpush.msk.msrb.mxu2 %vm523_vm14, %v1465_v4 }
 0x549   :  { %v303_v58 = vmul.f32 %v1324_v53, %v302_v56 }
 0x54b   :  { %v304_v60 = vadd.f32 %v1324_v53, %v303_v58  ;;  %v1608_v58 = vld [vmem:[#allocation4 + $0x90] sm:$0xff] }
 0x54c   :  { %434 = vmatpush.msrb.mxu0 %v1608_v58  ;;  %854 = vmatpush.msra.mxu2 %v1608_v58 }
 0x54d   :  { %v308_v5 = vsel %vm307_vm15, %v1324_v53, %v304_v60  ;;  %v1614_v60 = vld [vmem:[#allocation4 + $0x88] sm:$0xff] }
 0x54e   :  { %v313_v8 = vsel %vm310_vm4, %v312_v61, %v308_v5  ;;  %v1617_v5 = vld [vmem:[#allocation4 + $0x60] sm:$0xff]  ;;  %435 = vmatpush.msrb.mxu0 %v1614_v60  ;;  %855 = vmatpush.msra.mxu2 %v1614_v60 }
 0x54f   :  { %v353_v9 = vsel %vm352_vm0, %v313_v8, -inf  ;;  %v317_v10 = vsel %vm316_vm1, %v313_v8, -inf  ;;  %415 = vmatpush.msra.mxu3 %v1617_v5 }
 0x550   :  { %v354_v12 = vrot.slane %v353_v9, 4  ;;  %v318_v13 = vrot.slane %v317_v10, 4 }
 0x552   :  { %v355_v15 = vmax.f32 %v353_v9, %v354_v12  ;;  %v319_v16 = vmax.f32 %v317_v10, %v318_v13  ;;  %v1623_v9 = vld [vmem:[#allocation4 + $0x58] sm:$0xff] }
 0x553   :  { %v1625_v10 = vld [vmem:[#allocation4 + $0x78] sm:$0xff]  ;;  %416 = vmatpush.msra.mxu3 %v1623_v9 }
 0x554   :  { %v356_v17 = vrot.slane %v355_v15, 2  ;;  %v320_v18 = vrot.slane %v319_v16, 2 }
 0x555   :  { %599 = vmatpush.msrb.mxu3 %v1469_v6 }
 0x556   :  { %v357_v20 = vmax.f32 %v355_v15, %v356_v17  ;;  %v321_v21 = vmax.f32 %v319_v16, %v320_v18 }
 0x557   :  { %600 = vmatpush.msrb.mxu3 %v1471_v7 }
 0x558   :  { %v358_v22 = vrot.slane %v357_v20, 1  ;;  %v322_v23 = vrot.slane %v321_v21, 1 }
 0x559   :  { %601 = vmatpush.msrb.mxu3 %v1481_v11 }
 0x55a   :  { %v359_v25 = vmax.f32 %v357_v20, %v358_v22  ;;  %v323_v26 = vmax.f32 %v321_v21, %v322_v23 }
 0x55b   :  { %602 = vmatpush.msrb.mxu3 %v1513_v32 }
 0x55c   :  { %vm360_vm5 = vcmp.ge.f32.partialorder %v313_v8, %v359_v25  ;;  %vm324_vm6 = vcmp.ge.f32.partialorder %v313_v8, %v323_v26  ;;  %v1619_v8 = vld [vmem:[#allocation4 + $0x80] sm:$0xff] }
 0x55d   :  { %v364_v27 = vsel %vm360_vm5, %v362_v24, -3.0  ;;  %v326_v2 = vsel %vm324_vm6, %v1574_v19, -3.0  ;;  %436 = vmatpush.msrb.mxu0 %v1619_v8  ;;  %856 = vmatpush.msra.mxu2 %v1619_v8  ;;  %vm519_vm5 = vcmask 31744  }
 0x55e   :  { %v365_v28 = vsel %vm352_vm0, %v364_v27, -inf  ;;  %v327_v29 = vsel %vm316_vm1, %v326_v2, -inf }
 0x55f   :  { %v366_v31 = vrot.slane %v365_v28, 4  ;;  %v328_v33 = vrot.slane %v327_v29, 4  ;;  %437 = vmatpush.msrb.mxu0 %v1625_v10  ;;  %857 = vmatpush.msra.mxu2 %v1625_v10 }
 0x561   :  { %v367_v37 = vmax.f32 %v365_v28, %v366_v31  ;;  %v329_v38 = vmax.f32 %v327_v29, %v328_v33  ;;  %665 = vmatpush.msra.mxu0 %v1537_v62 }
 0x563   :  { %v368_v39 = vrot.slane %v367_v37, 2  ;;  %v330_v40 = vrot.slane %v329_v38, 2  ;;  %666 = vmatpush.msra.mxu0 %v1539_v63 }
 0x565   :  { %v369_v41 = vmax.f32 %v367_v37, %v368_v39  ;;  %v331_v45 = vmax.f32 %v329_v38, %v330_v40  ;;  %667 = vmatpush.msra.mxu0 %v1542_v0  ;;  %v1649_v37 = vld [vmem:[#allocation4 + $0xb8] sm:$0xff]  ;;  %v1651_v38 = vld [vmem:[#allocation4 + $0xb0] sm:$0xff]  ;;  %v1655_v39 = vld [vmem:[#allocation4 + $0xa8] sm:$0xff] }
 0x566   :  { %457 = vmatpush.msrb.mxu1 %v1649_v37  ;;  %v1661_v40 = vld [vmem:[#allocation4 + $0xa0] sm:$0xff] }
 0x567   :  { %v370_v46 = vrot.slane %v369_v41, 1  ;;  %v332_v42 = vrot.slane %v331_v45, 1  ;;  %668 = vmatpush.msra.mxu0 %v1545_v3 }
 0x568   :  { %458 = vmatpush.msrb.mxu1 %v1651_v38 }
 0x569   :  { %v1580_v47 = vmax.f32 %v369_v41, %v370_v46  ;;  %v1582_v48 = vmax.f32 %v331_v45, %v332_v42  ;;  %v52_v41 = vld [vmem:[#allocation4 + $0x98] sm:$0x3] }
 0x56a   :  { %459 = vmatpush.msrb.mxu1 %v1655_v39  ;;  %v1669_v45 = vperm.slane %v52_v41, 1  ;;  %v1671_v46 = vperm.slane %v52_v41, 0 }
 0x56b   :  { %v372_v49 = vsub.f32 0.0, %v1580_v47  ;;  %v334_v50 = vsub.f32 0.0, %v1582_v48  ;;  %v577_v48 = vrot.slane %v1520_v35, 4 }
 0x56c   :  { %460 = vmatpush.msrb.mxu1 %v1661_v40 }
 0x56d   :  { %vm1589_vm7 = vcmp.eq.f32.partialorder %v1571_v14, %v372_v49  ;;  %vm1596_vm8 = vcmp.eq.f32.partialorder %v1571_v14, %v334_v50  ;;  %vm563_vm13 = vcmp.lt.f32.partialorder %v1571_v14, %v372_v49  ;;  %vm548_vm6 = vcmp.lt.f32.partialorder %v1571_v14, %v334_v50 }
 0x56e   :  { %v1270_v53 = vsel %vm1589_vm7, 1.0, %v1421_v1  ;;  %v1269_v55 = vsel %vm1596_vm8, 1.0, %v1421_v1  ;;  %834 = vmatpush.msra.mxu1 %v1606_v57 }
 0x56f   :  { %378 = vperm.xlu1 %1305, %v1270_v53   ;;  %340 = vperm.xlu2 %1306, %v1269_v55  }
 0x570   :  { %835 = vmatpush.msra.mxu1 %v1610_v59 }
 0x572   :  { %836 = vmatpush.msra.mxu1 %v1617_v5 }
 0x574   :  { %837 = vmatpush.msra.mxu1 %v1623_v9 }
 0x5c9   :  { %v341_v56 = vpop.permute.xlu2 %340 }
 0x5ca   :  { %v343_v61 = vmul.f32 %v341_v56, %v1562_v44 }
 0x5cc   :  { %v345_v12 = vsel %vm344_vm9, %v343_v61, 0.0 }
 0x5cd   :  { %v346_v13 = vrot.slane %v345_v12, 4 }
 0x5cf   :  { %v347_v17 = vadd.f32 %v346_v13, %v345_v12  ;;  %v1426_v13 = vmov 0  }
 0x5d0   :  { %v374_v49 = vsel %vm1589_vm7, 1, %v1426_v13 }
 0x5d1   :  { %v348_v21 = vrot.slane %v347_v17, 2 }
 0x5d3   :  { %v349_v24 = vadd.f32 %v348_v21, %v347_v17 }
 0x5d5   :  { %v350_v27 = vrot.slane %v349_v24, 1 }
 0x5d7   :  { %v351_v29 = vadd.f32 %v350_v27, %v349_v24 }
 0x5e1   :  { %v379_v15 = vpop.permute.xlu1 %378 }
 0x5e2   :  { %v380_v16 = vrot.slane %v379_v15, 5  ;;  %v336_v15 = vsel %vm1596_vm8, 1, %v1426_v13 }
 0x5e4   :  { %v382_v18 = vmul.f32 %v380_v16, %v1562_v44 }
 0x5e6   :  { %v384_v20 = vrot.slane %v382_v18, 3 }
 0x5e8   :  { %v386_v22 = vsel %vm344_vm9, %v384_v20, 0.0 }
 0x5e9   :  { %v387_v23 = vrot.slane %v386_v22, 4 }
 0x5eb   :  { %v388_v25 = vadd.f32 %v387_v23, %v386_v22 }
 0x5ed   :  { %v389_v26 = vrot.slane %v388_v25, 2 }
 0x5ef   :  { %v390_v2 = vadd.f32 %v389_v26, %v388_v25 }
 0x5f1   :  { %v391_v28 = vrot.slane %v390_v2, 1 }
 0x5f3   :  { %v392_v31 = vadd.f32 %v391_v28, %v390_v2 }
 0x5f5   :  { %v1643_v44 = vsel %vm393_vm10, %v351_v29, %v392_v31 }
 0x5f6   :  { %397 = vrot.lane.b32.xlu1 %v1643_v44, %s1423_s29 }
 0x668   :  { %v398_v33 = vpop.permute.xlu1 %397 }
 0x669   :  { %1271 = vmatmul.msk.f32.vlgmr.msra.gmra.mxu3 %vm147_vm2, %v398_v33  ;;  %1272 = vmatmul.msk.f32.vlgmr.msrb.gmra.mxu0 %vm147_vm2, %v398_v33 }
 0x66a   :  { %877 = vmatpush.msra.mxu3 %v1649_v37  ;;  %1286 = vmatpush.msk.msrb.mxu0 %vm523_vm14, %v1465_v4  ;;  %vm610_vm14 = vcmask 1041408  }
 0x66c   :  { %878 = vmatpush.msra.mxu3 %v1651_v38 }
 0x66e   :  { %879 = vmatpush.msra.mxu3 %v1655_v39 }
 0x670   :  { %880 = vmatpush.msra.mxu3 %v1661_v40 }
 0x6e6   :  { %v439_v42 = vpop.f32.mrf.mxu0 }
 0x6e7   :  { %v440_v55 = vadd.f32 %v439_v42, %v1669_v45 }
 0x6ec   :  { %v418_v53 = vpop.f32.mrf.mxu3 }
 0x6ed   :  { %v419_v56 = vadd.f32 %v418_v53, %v1671_v46 }
 0x6ef   :  { %1273 = vmatmul.msk.f32.vlgmr.msrb.gmra.mxu1 %vm147_vm2, %v419_v56  ;;  %v466_v61 = vmul.f32 %v440_v55, %v419_v56 }
 0x6f0   :  { %1012 = vmatpush.msrb.mxu1 %v1469_v6 }
 0x6f1   :  { %v468_v12 = vsel %vm467_vm11, %v466_v61, 0.0 }
 0x6f2   :  { %469 = vadd.xlane.f32.xlu2 %v468_v12  ;;  %1013 = vmatpush.msrb.mxu1 %v1471_v7  ;;  %v572_v7 = vsel %vm563_vm13, 1, %v1426_v13  ;;  %v557_v12 = vsel %vm548_vm6, 1, %v1426_v13 }
 0x6f4   :  { %1014 = vmatpush.msrb.mxu1 %v1481_v11 }
 0x6f6   :  { %1015 = vmatpush.msrb.mxu1 %v1513_v32 }
 0x70a   :  { %550 = vperm.xlu2 %1306, %v336_v15  }
 0x765   :  { %v470_v11 = vpop.xlane.xlu2 %469 }
 0x766   :  { %v471_v32 = vmul.f32 0.17677669, %v470_v11 }
 0x76c   :  { %v462_v16 = vpop.f32.mrf.mxu1 }
 0x76d   :  { %v465_v17 = vmul.f32 0.17677669, %v462_v16  ;;  %v551_v15 = vpop.permute.xlu2 %550 }
 0x76e   :  { %vm552_vm7 = vcmp.eq.s32.totalorder %v551_v15, 1 }
 0x76f   :  { %v473_v6 = vsel %vm472_vm12, %v465_v17, -inf }
 0x770   :  { %474 = vmax.xlane.f32.xlu1 %v473_v6 }
 0x789   :  { %574 = vperm.xlu1 %1305, %v572_v7   ;;  %v554_v7 = vrot.slane %v1520_v35, 1 }
 0x7e3   :  { %v475_v18 = vpop.xlane.xlu1 %474 }
 0x7e4   :  { %v476_v20 = vmax.f32 %v475_v18, %v471_v32 }
 0x7e6   :  { %v1689_v52 = vsub.f32 %v465_v17, %v476_v20  ;;  %v1691_v21 = vsub.f32 %v471_v32, %v476_v20 }
 0x7e8   :  { %v478_v22 = vmul.f32 1.442695, %v1689_v52  ;;  %v481_v24 = vmul.f32 1.442695, %v1691_v21 }
 0x7ea   :  { %1325 = vpow2.f32 %v478_v22 }
 0x7eb   :  { %1327 = vpow2.f32 %v481_v24 }
 0x7f0   :  { %v1694_v23 = vpop.eup %1325 }
 0x7f1   :  { %v483_v47 = vsel %vm472_vm12, %v1694_v23, 0.0  ;;  %v1708_v25 = vpop.eup %1327 }
 0x7f2   :  { %484 = vadd.xlane.f32.xlu0 %v483_v47 }
 0x7fb   :  { %v575_v6 = vpop.permute.xlu1 %574 }
 0x7fc   :  { %vm576_vm9 = vcmp.eq.s32.totalorder %v575_v6, 1 }
 0x806   :  { %565 = vperm.xlu0 %1307, %v374_v49  }
 0x865   :  { %v485_v51 = vpop.xlane.xlu0 %484 }
 0x866   :  { %v1711_v26 = vadd.f32 %v1708_v25, %v485_v51 }
 0x868   :  { %1329 = vrcp.f32 %v1711_v26  ;;  %v498_v28 = vand.u32 2147483648, %v1711_v26  ;;  %v496_v31 = vand.u32 2147483647, %v1711_v26  ;;  %vm492_vm0 = vweird.f32 %v1711_v26 }
 0x86a   :  { %v499_v41 = vor.u32 1.1754944e-38, %v498_v28  ;;  %vm497_vm4 = vcmp.eq.f32.partialorder %v496_v31, 8.507059e+37 }
 0x86e   :  { %v1330_v4 = vpop.eup %1329 }
 0x86f   :  { %v488_v27 = vmul.f32 %v1330_v4, %v1711_v26  ;;  %vm493_vm15 = vweird.f32 %v1330_v4 }
 0x870   :  { %vm494_vm1 = vmor %vm492_vm0, %vm493_vm15 }
 0x871   :  { %v489_v2 = vsub.f32 1.0, %v488_v27 }
 0x873   :  { %v490_v29 = vmul.f32 %v1330_v4, %v489_v2 }
 0x875   :  { %v491_v33 = vadd.f32 %v1330_v4, %v490_v29 }
 0x877   :  { %v495_v42 = vsel %vm494_vm1, %v1330_v4, %v491_v33 }
 0x878   :  { %v1718_v53 = vsel %vm497_vm4, %v499_v41, %v495_v42  ;;  %v566_v17 = vpop.permute.xlu0 %565 }
 0x879   :  { %v502_v55 = vmul.f32 %v1694_v23, %v1718_v53  ;;  %v503_v56 = vmul.f32 %v1708_v25, %v1718_v53  ;;  %vm567_vm8 = vcmp.eq.s32.totalorder %v566_v17, 1 }
 0x87b   :  { %1275 = vmatmul.msk.f32.vlgmr.msrb.gmra.mxu2 %vm519_vm5, %v502_v55  ;;  %v514_v61 = vmul.f32 %v503_v56, %v1643_v44 }
 0x87c   :  { %1077 = vmatpush.msrb.mxu2 %v1537_v62 }
 0x87d   :  { %516 = vrot.lane.b32.xlu2 %v514_v61, %s1423_s29 }
 0x87e   :  { %1078 = vmatpush.msrb.mxu2 %v1539_v63  ;;  %v569_v63 = vrot.slane %v1520_v35, 5 }
 0x880   :  { %1079 = vmatpush.msrb.mxu2 %v1542_v0 }
 0x882   :  { %1080 = vmatpush.msrb.mxu2 %v1545_v3 }
 0x885   :  { %559 = vperm.xlu2 %1306, %v557_v12  }
 0x8d7   :  { %v517_v16 = vpop.permute.xlu2 %516 }
 0x8df   :  { %v560_v3 = vpop.permute.xlu2 %559 }
 0x8e0   :  { %vm561_vm13 = vcmp.eq.s32.totalorder %v560_v3, 1 }
 0x8fe   :  { %v543_v44 = vpop.f32.mrf.mxu2 }
 0x8ff   :  { %v544_v62 = vadd.f32 %v543_v44, %v517_v16 }
 0x901   :  { %v553_v0 = vperm.slane %v544_v62, 0  ;;  %v568_v11 = vperm.slane %v544_v62, 1 }
 0x903   :  { %v556_v50 = vsel %vm552_vm7, %v553_v0, %v554_v7  ;;  %v571_v32 = vsel %vm567_vm8, %v568_v11, %v569_v63 }
 0x904   :  { %v1738_v18 = vsel %vm576_vm9, %v577_v48, %v571_v32  ;;  %v1742_v22 = vsel %vm561_vm13, %v1520_v35, %v556_v50  ;;  %vm717_vm9 = vcmask 257024  }
 0x905   :  { %v581_v20 = vrot.slane %v1738_v18, 5 }
 0x907   :  { %v583_v47 = vsel %vm174_vm3, %v1742_v22, %v581_v20 }
 0x908   :  { %1276 = vmatmul.msk.f32.vlgmr.msrb.gmra.mxu3 %vm147_vm2, %v583_v47 }
 0x909   :  { %1141 = vmatpush.msrb.mxu3 %v1606_v57 }
 0x90b   :  { %1142 = vmatpush.msrb.mxu3 %v1610_v59 }
 0x90d   :  { %1143 = vmatpush.msrb.mxu3 %v1617_v5 }
 0x90f   :  { %1144 = vmatpush.msrb.mxu3 %v1623_v9 }
 0x98b   :  { %v604_v49 = vpop.f32.mrf.mxu3 }
 0x98c   :  { %v605_v24 = vadd.f32 %v604_v49, %v1524_v36 }
 0x98e   :  { %v608_v51 = vrot.slane %v605_v24, 1  ;;  %v612_v35 = vrot.slane %v605_v24, 2 }
 0x990   :  { %v611_v4 = vsel %vm610_vm14, %v605_v24, %v608_v51  ;;  %v1754_v27 = vsel %vm610_vm14, %v608_v51, %v612_v35 }
 0x991   :  { %v615_v2 = vadd.f32 %v611_v4, %v1516_v34 }
 0x993   :  { %v1277_v57 = vmul.f32 -1.442695, %v615_v2 }
 0x995   :  { %1331 = vpow2.f32 %v1277_v57 }
 0x99b   :  { %v1332_v59 = vpop.eup %1331 }
 0x99c   :  { %v619_v28 = vadd.f32 1.0, %v1332_v59 }
 0x99e   :  { %1333 = vrcp.f32 %v619_v28  ;;  %v631_v31 = vand.u32 2147483648, %v619_v28  ;;  %v629_v41 = vand.u32 2147483647, %v619_v28  ;;  %vm625_vm15 = vweird.f32 %v619_v28 }
 0x9a0   :  { %v632_v55 = vor.u32 1.1754944e-38, %v631_v31  ;;  %vm630_vm1 = vcmp.eq.f32.partialorder %v629_v41, 8.507059e+37 }
 0x9a4   :  { %v1334_v5 = vpop.eup %1333 }
 0x9a5   :  { %v621_v9 = vmul.f32 %v1334_v5, %v619_v28  ;;  %vm626_vm3 = vweird.f32 %v1334_v5 }
 0x9a6   :  { %vm627_vm0 = vmor %vm625_vm15, %vm626_vm3 }
 0x9a7   :  { %v622_v29 = vsub.f32 1.0, %v621_v9 }
 0x9a9   :  { %v623_v33 = vmul.f32 %v1334_v5, %v622_v29 }
 0x9ab   :  { %v624_v42 = vadd.f32 %v1334_v5, %v623_v33 }
 0x9ad   :  { %v628_v56 = vsel %vm627_vm0, %v1334_v5, %v624_v42  ;;  %vm776_vm0 = vcmask 265474  }
 0x9ae   :  { %v633_v61 = vsel %vm630_vm1, %v632_v55, %v628_v56  ;;  %vm741_vm1 = vcmask 263424  }
 0x9af   :  { %v635_v12 = vmul.f32 %v633_v61, %v1532_v54  ;;  %v642_v17 = vsub.f32 1.0, %v633_v61 }
 0x9b1   :  { %637 = vrot.lane.b32.xlu1 %v635_v12, %s1422_s28 }
 0xa23   :  { %v638_v15 = vpop.permute.xlu1 %637 }
 0xa24   :  { %v640_v16 = vadd.f32 %v638_v15, %v611_v4 }
 0xa26   :  { %1335 = vtanh.f32 %v640_v16 }
 0xa2c   :  { %v1336_v44 = vpop.eup %1335 }
 0xa2d   :  { %644 = vrot.lane.b32.xlu2 %v1336_v44, %s1423_s29 }
 0xa87   :  { %v645_v62 = vpop.permute.xlu2 %644 }
 0xa88   :  { %v647_v6 = vmul.f32 %v645_v62, %v642_v17 }
 0xa8a   :  { %649 = vrot.lane.b32.xlu0 %v647_v6, %s1423_s29 }
 0xafc   :  { %v650_v7 = vpop.permute.xlu0 %649 }
 0xafd   :  { %1278 = vmatmul.msk.f32.vlgmr.msra.gmra.mxu0 %vm147_vm2, %v650_v7 }
 0xafe   :  { %1161 = vmatpush.msra.mxu0 %v1608_v58 }
 0xb00   :  { %1162 = vmatpush.msra.mxu0 %v1614_v60 }
 0xb02   :  { %1163 = vmatpush.msra.mxu0 %v1619_v8 }
 0xb04   :  { %1164 = vmatpush.msra.mxu0 %v1625_v10 }
 0xb7a   :  { %v670_v63 = vpop.f32.mrf.mxu0 }
 0xb7b   :  { %v671_v0 = vadd.f32 %v670_v63, %v1516_v34 }
 0xb7d   :  { %694 = vrot.lane.b32.xlu1 %v671_v0, %s1422_s28  ;;  %v673_v11 = vadd.f32 %v671_v0, %v1754_v27 }
 0xb7f   :  { %v1279_v48 = vmul.f32 -1.442695, %v673_v11 }
 0xb81   :  { %1337 = vpow2.f32 %v1279_v48 }
 0xb87   :  { %v1338_v3 = vpop.eup %1337 }
 0xb88   :  { %v677_v50 = vadd.f32 1.0, %v1338_v3 }
 0xb8a   :  { %1339 = vrcp.f32 %v677_v50  ;;  %v689_v8 = vand.u32 2147483648, %v677_v50  ;;  %vm683_vm6 = vweird.f32 %v677_v50  ;;  %v687_v10 = vand.u32 2147483647, %v677_v50 }
 0xb8c   :  { %v690_v24 = vor.u32 1.1754944e-38, %v689_v8  ;;  %vm688_vm8 = vcmp.eq.f32.partialorder %v687_v10, 8.507059e+37 }
 0xb90   :  { %v1340_v32 = vpop.eup %1339 }
 0xb91   :  { %v679_v58 = vmul.f32 %v1340_v32, %v677_v50  ;;  %vm684_vm4 = vweird.f32 %v1340_v32 }
 0xb92   :  { %vm685_vm7 = vmor %vm683_vm6, %vm684_vm4 }
 0xb93   :  { %v680_v20 = vsub.f32 1.0, %v679_v58 }
 0xb95   :  { %v681_v60 = vmul.f32 %v1340_v32, %v680_v20 }
 0xb97   :  { %v682_v47 = vadd.f32 %v1340_v32, %v681_v60 }
 0xb99   :  { %v686_v49 = vsel %vm685_vm7, %v1340_v32, %v682_v47 }
 0xb9a   :  { %v691_v35 = vsel %vm688_vm8, %v690_v24, %v686_v49  ;;  %v785_v49 = vrot.slane %v1574_v19, 6 }
 0xb9b   :  { %v704_v28 = vsub.f32 1.0, %v691_v35  ;;  %v710_v9 = vmul.f32 %v691_v35, %v647_v6 }
 0xbef   :  { %v695_v51 = vpop.permute.xlu1 %694 }
 0xbf0   :  { %v697_v4 = vmul.f32 %v695_v51, %v691_v35 }
 0xbf2   :  { %699 = vrot.lane.b32.xlu2 %v697_v4, %s1422_s28 }
 0xc4c   :  { %v700_v2 = vpop.permute.xlu2 %699 }
 0xc4d   :  { %v702_v57 = vadd.f32 %v700_v2, %v1754_v27 }
 0xc4f   :  { %1341 = vtanh.f32 %v702_v57 }
 0xc55   :  { %v1342_v59 = vpop.eup %1341 }
 0xc56   :  { %706 = vrot.lane.b32.xlu0 %v1342_v59, %s1423_s29 }
 0xcc8   :  { %v707_v5 = vpop.permute.xlu0 %706 }
 0xcc9   :  { %v709_v29 = vmul.f32 %v707_v5, %v704_v28 }
 0xccb   :  { %v1772_v31 = vadd.f32 %v710_v9, %v709_v29 }
 0xccd   :  { %v712_v33 = vmul.f32 %v1772_v31, %v1560_v43 }
 0xccf   :  { %714 = vrot.lane.b32.xlu1 %v712_v33, %s1423_s29 }
 0xd41   :  { %v715_v41 = vpop.permute.xlu1 %714 }
 0xd42   :  { %v718_v42 = vsel %vm717_vm9, %v715_v41, 0.0 }
 0xd43   :  { %719 = vadd.xlane.f32.xlu2 %v718_v42 }
 0xdb6   :  { %v720_v27 = vpop.xlane.xlu2 %719 }
 0xdb7   :  { %v721_v55 = vadd.f32 %v1555_v30, %v720_v27 }
 0xdb9   :  { %v1280_v56 = vmul.f32 -1.442695, %v721_v55 }
 0xdbb   :  { %1343 = vpow2.f32 %v1280_v56 }
 0xdc1   :  { %v1344_v61 = vpop.eup %1343 }
 0xdc2   :  { %v725_v12 = vadd.f32 1.0, %v1344_v61 }
 0xdc4   :  { %1345 = vrcp.f32 %v725_v12  ;;  %v737_v17 = vand.u32 2147483648, %v725_v12  ;;  %v735_v43 = vand.u32 2147483647, %v725_v12  ;;  %vm731_vm3 = vweird.f32 %v725_v12 }
 0xdc6   :  { %v738_v7 = vor.u32 1.1754944e-38, %v737_v17  ;;  %vm736_vm4 = vcmp.eq.f32.partialorder %v735_v43, 8.507059e+37 }
 0xdca   :  { %v1346_v15 = vpop.eup %1345 }
 0xdcb   :  { %v727_v16 = vmul.f32 %v1346_v15, %v725_v12  ;;  %vm732_vm13 = vweird.f32 %v1346_v15 }
 0xdcc   :  { %vm733_vm15 = vmor %vm731_vm3, %vm732_vm13  ;;  %vm768_vm13 = vcmask 517376  }
 0xdcd   :  { %v728_v44 = vsub.f32 1.0, %v727_v16 }
 0xdcf   :  { %v729_v62 = vmul.f32 %v1346_v15, %v728_v44 }
 0xdd1   :  { %v730_v6 = vadd.f32 %v1346_v15, %v729_v62 }
 0xdd3   :  { %v734_v30 = vsel %vm733_vm15, %v1346_v15, %v730_v6 }
 0xdd4   :  { %v739_v63 = vsel %vm736_vm4, %v738_v7, %v734_v30 }
 0xdd5   :  { %v777_v0 = vsel %vm776_vm0, %v739_v63, -inf  ;;  %v742_v11 = vsel %vm741_vm1, %v739_v63, -inf }
 0xdd6   :  { %v778_v48 = vrot.slane %v777_v0, 4  ;;  %v743_v3 = vrot.slane %v742_v11, 4 }
 0xdd8   :  { %v779_v50 = vmax.f32 %v777_v0, %v778_v48  ;;  %v744_v32 = vmax.f32 %v742_v11, %v743_v3 }
 0xdda   :  { %v780_v58 = vrot.slane %v779_v50, 2  ;;  %v745_v20 = vrot.slane %v744_v32, 2 }
 0xddc   :  { %v781_v60 = vmax.f32 %v779_v50, %v780_v58  ;;  %v746_v47 = vmax.f32 %v744_v32, %v745_v20 }
 0xdde   :  { %v782_v8 = vrot.slane %v781_v60, 1  ;;  %v747_v10 = vrot.slane %v746_v47, 1 }
 0xde0   :  { %v783_v24 = vmax.f32 %v781_v60, %v782_v8  ;;  %v748_v51 = vmax.f32 %v746_v47, %v747_v10 }
 0xde2   :  { %vm784_vm6 = vcmp.ge.f32.partialorder %v739_v63, %v783_v24  ;;  %vm749_vm7 = vcmp.ge.f32.partialorder %v739_v63, %v748_v51 }
 0xde3   :  { %v787_v35 = vsel %vm784_vm6, %v785_v49, -2.0  ;;  %v750_v4 = vsel %vm749_vm7, %v1574_v19, -2.0 }
 0xde4   :  { %v788_v2 = vsel %vm776_vm0, %v787_v35, -inf  ;;  %v751_v57 = vsel %vm741_vm1, %v750_v4, -inf }
 0xde5   :  { %v789_v59 = vrot.slane %v788_v2, 4  ;;  %v752_v28 = vrot.slane %v751_v57, 4 }
 0xde7   :  { %v790_v5 = vmax.f32 %v788_v2, %v789_v59  ;;  %v753_v9 = vmax.f32 %v751_v57, %v752_v28 }
 0xde9   :  { %v791_v29 = vrot.slane %v790_v5, 2  ;;  %v754_v33 = vrot.slane %v753_v9, 2 }
 0xdeb   :  { %v792_v41 = vmax.f32 %v790_v5, %v791_v29  ;;  %v755_v42 = vmax.f32 %v753_v9, %v754_v33 }
 0xded   :  { %v793_v27 = vrot.slane %v792_v41, 1  ;;  %v756_v55 = vrot.slane %v755_v42, 1 }
 0xdef   :  { %v794_v56 = vmax.f32 %v792_v41, %v793_v27  ;;  %v757_v61 = vmax.f32 %v755_v42, %v756_v55 }
 0xdf1   :  { %v795_v12 = vsub.f32 0.0, %v794_v56  ;;  %v758_v15 = vsub.f32 0.0, %v757_v61 }
 0xdf3   :  { %vm1785_vm8 = vcmp.eq.f32.partialorder %v1571_v14, %v795_v12  ;;  %vm1790_vm9 = vcmp.eq.f32.partialorder %v1571_v14, %v758_v15  ;;  %vm962_vm3 = vcmp.lt.f32.partialorder %v1571_v14, %v758_v15  ;;  %vm978_vm15 = vcmp.lt.f32.partialorder %v1571_v14, %v795_v12 }
 0xdf4   :  { %v1282_v44 = vsel %vm1785_vm8, 1.0, %v1421_v1  ;;  %v1281_v17 = vsel %vm1790_vm9, 1.0, %v1421_v1  ;;  %v987_v5 = vsel %vm978_vm15, 1, %v1426_v13 }
 0xdf5   :  { %801 = vperm.xlu0 %1307, %v1282_v44   ;;  %764 = vperm.xlu1 %1305, %v1281_v17  }
 0xe67   :  { %v802_v62 = vpop.permute.xlu0 %801  ;;  %v765_v43 = vpop.permute.xlu1 %764 }
 0xe68   :  { %v803_v6 = vrot.slane %v802_v62, 6  ;;  %v767_v7 = vmul.f32 %v765_v43, %v1772_v31 }
 0xe6a   :  { %v805_v30 = vmul.f32 %v803_v6, %v1772_v31  ;;  %v769_v63 = vsel %vm768_vm13, %v767_v7, 0.0 }
 0xe6b   :  { %v770_v0 = vrot.slane %v769_v63, 4 }
 0xe6c   :  { %v807_v11 = vrot.slane %v805_v30, 2 }
 0xe6d   :  { %v771_v48 = vadd.f32 %v770_v0, %v769_v63 }
 0xe6e   :  { %v809_v3 = vsel %vm768_vm13, %v807_v11, 0.0 }
 0xe6f   :  { %v810_v50 = vrot.slane %v809_v3, 4  ;;  %v772_v32 = vrot.slane %v771_v48, 2 }
 0xe71   :  { %v811_v58 = vadd.f32 %v810_v50, %v809_v3  ;;  %v773_v20 = vadd.f32 %v772_v32, %v771_v48  ;;  %v760_v32 = vsel %vm1790_vm9, 1, %v1426_v13 }
 0xe73   :  { %v812_v1 = vrot.slane %v811_v58, 2  ;;  %v774_v47 = vrot.slane %v773_v20, 1 }
 0xe75   :  { %v813_v60 = vadd.f32 %v812_v1, %v811_v58  ;;  %v775_v10 = vadd.f32 %v774_v47, %v773_v20 }
 0xe77   :  { %v814_v8 = vrot.slane %v813_v60, 1 }
 0xe79   :  { %v815_v49 = vadd.f32 %v814_v8, %v813_v60 }
 0xe7b   :  { %v1803_v24 = vsel %vm393_vm10, %v775_v10, %v815_v49  ;;  %v969_v10 = vrot.slane %v1742_v22, 1 }
 0xe7c   :  { %818 = vrot.lane.b32.xlu0 %v1803_v24, %s1423_s29 }
 0xeee   :  { %v819_v31 = vpop.permute.xlu0 %818 }
 0xeef   :  { %1283 = vmatmul.msk.f32.vlgmr.msra.gmra.mxu1 %vm147_vm2, %v819_v31  ;;  %1284 = vmatmul.msk.f32.vlgmr.msra.gmra.mxu2 %vm147_vm2, %v819_v31 }
 0xef0   :  { %1184 = vmatpush.msra.mxu1 %v1649_v37  ;;  %v797_v37 = vsel %vm1785_vm8, 1, %v1426_v13 }
 0xef2   :  { %1185 = vmatpush.msra.mxu1 %v1651_v38  ;;  %v972_v38 = vsel %vm962_vm3, 1, %v1426_v13 }
 0xef4   :  { %1186 = vmatpush.msra.mxu1 %v1655_v39 }
 0xef6   :  { %1187 = vmatpush.msra.mxu1 %v1661_v40 }
 0xf6c   :  { %v839_v51 = vpop.f32.mrf.mxu1 }
 0xf6d   :  { %v840_v35 = vadd.f32 %v839_v51, %v1671_v46  ;;  %v984_v51 = vrot.slane %v1738_v18, 1 }
 0xf6f   :  { %1285 = vmatmul.msk.f32.vlgmr.msra.gmra.mxu3 %vm147_vm2, %v840_v35 }
 0xf72   :  { %v859_v4 = vpop.f32.mrf.mxu2 }
 0xf73   :  { %v860_v2 = vadd.f32 %v859_v4, %v1669_v45 }
 0xf75   :  { %v886_v57 = vmul.f32 %v860_v2, %v840_v35 }
 0xf77   :  { %v887_v59 = vsel %vm467_vm11, %v886_v57, 0.0 }
 0xf78   :  { %888 = vadd.xlane.f32.xlu1 %v887_v59 }
 0xf91   :  { %980 = vperm.xlu1 %1305, %v797_v37  }
 0xf99   :  { %974 = vperm.xlu1 %1305, %v972_v38  }
 0xfeb   :  { %v889_v9 = vpop.xlane.xlu1 %888 }
 0xfec   :  { %v890_v29 = vmul.f32 0.17677669, %v889_v9 }
 0xff2   :  { %v882_v39 = vpop.f32.mrf.mxu3 }
 0xff3   :  { %v885_v40 = vmul.f32 0.17677669, %v882_v39 }
 0xff5   :  { %v891_v28 = vsel %vm472_vm12, %v885_v40, -inf }
 0xff6   :  { %892 = vmax.xlane.f32.xlu0 %v891_v28 }
0x1003   :  { %v981_v20 = vpop.permute.xlu1 %980 }
0x100a   :  { %989 = vperm.xlu0 %1307, %v987_v5  }
0x1069   :  { %v893_v33 = vpop.xlane.xlu0 %892 }
0x106a   :  { %v894_v41 = vmax.f32 %v893_v33, %v890_v29 }
0x106c   :  { %v1825_v42 = vsub.f32 %v885_v40, %v894_v41  ;;  %v1827_v27 = vsub.f32 %v890_v29, %v894_v41 }
0x106e   :  { %v896_v55 = vmul.f32 1.442695, %v1825_v42  ;;  %v899_v14 = vmul.f32 1.442695, %v1827_v27 }
0x1070   :  { %1347 = vpow2.f32 %v896_v55 }
0x1071   :  { %1349 = vpow2.f32 %v899_v14 }
0x1076   :  { %v1830_v56 = vpop.eup %1347 }
0x1077   :  { %v901_v61 = vsel %vm472_vm12, %v1830_v56, 0.0  ;;  %v1835_v12 = vpop.eup %1349 }
0x1078   :  { %902 = vadd.xlane.f32.xlu2 %v901_v61 }
0x107c   :  { %v990_v8 = vpop.permute.xlu0 %989 }
0x107d   :  { %vm991_vm8 = vcmp.eq.s32.totalorder %v990_v8, 1 }
0x10eb   :  { %v903_v15 = vpop.xlane.xlu2 %902 }
0x10ec   :  { %v1838_v19 = vadd.f32 %v1835_v12, %v903_v15 }
0x10ee   :  { %1351 = vrcp.f32 %v1838_v19  ;;  %v916_v43 = vand.u32 2147483648, %v1838_v19  ;;  %v914_v7 = vand.u32 2147483647, %v1838_v19  ;;  %vm910_vm1 = vweird.f32 %v1838_v19 }
0x10f0   :  { %v917_v63 = vor.u32 1.1754944e-38, %v916_v43  ;;  %vm915_vm6 = vcmp.eq.f32.partialorder %v914_v7, 8.507059e+37 }
0x10f4   :  { %v1352_v44 = vpop.eup %1351 }
0x10f5   :  { %v906_v17 = vmul.f32 %v1352_v44, %v1838_v19  ;;  %vm911_vm0 = vweird.f32 %v1352_v44 }
0x10f6   :  { %vm912_vm4 = vmor %vm910_vm1, %vm911_vm0 }
0x10f7   :  { %v907_v62 = vsub.f32 1.0, %v906_v17 }
0x10f9   :  { %v908_v6 = vmul.f32 %v1352_v44, %v907_v62 }
0x10fb   :  { %v909_v30 = vadd.f32 %v1352_v44, %v908_v6 }
0x10fd   :  { %v913_v0 = vsel %vm912_vm4, %v1352_v44, %v909_v30 }
0x10fe   :  { %v1845_v11 = vsel %vm915_vm6, %v917_v63, %v913_v0  ;;  %vm1238_vm6 = vcmask 33824  }
0x10ff   :  { %v920_v48 = vmul.f32 %v1830_v56, %v1845_v11  ;;  %v921_v3 = vmul.f32 %v1835_v12, %v1845_v11 }
0x1101   :  { %1287 = vmatmul.msk.f32.vlgmr.msrb.gmra.mxu0 %vm519_vm5, %v920_v48  ;;  %v932_v50 = vmul.f32 %v921_v3, %v1803_v24  ;;  %vm982_vm5 = vcmp.eq.s32.totalorder %v981_v20, 1  ;;  %v975_v24 = vpop.permute.xlu1 %974 }
0x1102   :  { %vm976_vm9 = vcmp.eq.s32.totalorder %v975_v24, 1 }
0x1103   :  { %934 = vrot.lane.b32.xlu2 %v932_v50, %s1423_s29 }
0x110b   :  { %964 = vperm.xlu2 %1306, %v760_v32  }
0x115d   :  { %v935_v58 = vpop.permute.xlu2 %934 }
0x1165   :  { %v965_v60 = vpop.permute.xlu2 %964 }
0x1166   :  { %vm966_vm7 = vcmp.eq.s32.totalorder %v965_v60, 1 }
0x117e   :  { %v957_v1 = vpop.f32.mrf.mxu0 }
0x117f   :  { %v958_v47 = vadd.f32 %v957_v1, %v935_v58 }
0x1181   :  { %v967_v49 = vperm.slane %v958_v47, 0  ;;  %v983_v31 = vperm.slane %v958_v47, 1 }
0x1183   :  { %v971_v35 = vsel %vm966_vm7, %v967_v49, %v969_v10  ;;  %v986_v16 = vsel %vm982_vm5, %v983_v31, %v984_v51 }
0x1184   :  { %v992_v13 = vsel %vm991_vm8, %v1738_v18, %v986_v16  ;;  %v977_v2 = vsel %vm976_vm9, %v1742_v22, %v971_v35  ;;  %vm1240_vm9 = vcmask 66624  }
0x1185   :  { %v994_v4 = vrot.slane %v992_v13, 6 }
0x1187   :  { %v996_v57 = vsel %vm610_vm14, %v977_v2, %v994_v4 }
0x1188   :  { %1288 = vmatmul.msk.f32.vlgmr.msrb.gmra.mxu1 %vm147_vm2, %v996_v57 }
0x1205   :  { %v1017_v59 = vpop.f32.mrf.mxu1 }
0x1206   :  { %v1018_v37 = vadd.f32 %v1017_v59, %v1524_v36 }
0x1208   :  { %v1021_v38 = vrot.slane %v1018_v37, 1  ;;  %v1024_v39 = vrot.slane %v1018_v37, 2 }
0x120a   :  { %v1023_v40 = vsel %vm393_vm10, %v1018_v37, %v1021_v38  ;;  %v1026_v28 = vsel %vm393_vm10, %v1021_v38, %v1024_v39 }
0x120b   :  { %v1027_v5 = vadd.f32 %v1023_v40, %v1516_v34 }
0x120d   :  { %v1289_v18 = vmul.f32 -1.442695, %v1027_v5 }
0x120f   :  { %1353 = vpow2.f32 %v1289_v18 }
0x1215   :  { %v1354_v9 = vpop.eup %1353 }
0x1216   :  { %v1031_v29 = vadd.f32 1.0, %v1354_v9 }
0x1218   :  { %1355 = vrcp.f32 %v1031_v29  ;;  %v1043_v55 = vand.u32 2147483648, %v1031_v29  ;;  %v1041_v36 = vand.u32 2147483647, %v1031_v29  ;;  %vm1037_vm13 = vweird.f32 %v1031_v29 }
0x121a   :  { %v1044_v15 = vor.u32 1.1754944e-38, %v1043_v55  ;;  %vm1042_vm10 = vcmp.eq.f32.partialorder %v1041_v36, 8.507059e+37 }
0x121e   :  { %v1356_v22 = vpop.eup %1355 }
0x121f   :  { %v1033_v33 = vmul.f32 %v1356_v22, %v1031_v29  ;;  %vm1038_vm14 = vweird.f32 %v1356_v22 }
0x1220   :  { %vm1039_vm3 = vmor %vm1037_vm13, %vm1038_vm14 }
0x1221   :  { %v1034_v41 = vsub.f32 1.0, %v1033_v33  ;;  %v506_v33 = vmul.f32 %v1694_v23, %v1689_v52  ;;  %v924_v23 = vmul.f32 %v1830_v56, %v1825_v42 }
0x1223   :  { %v1035_v61 = vmul.f32 %v1356_v22, %v1034_v41  ;;  %v507_v41 = vsel %vm472_vm12, %v506_v33, 0.0 }
0x1225   :  { %v1036_v14 = vadd.f32 %v1356_v22, %v1035_v61 }
0x1227   :  { %v1040_v44 = vsel %vm1039_vm3, %v1356_v22, %v1036_v14 }
0x1228   :  { %v1045_v17 = vsel %vm1042_vm10, %v1044_v15, %v1040_v44 }
0x1229   :  { %v1047_v62 = vmul.f32 %v1045_v17, %v1532_v54  ;;  %v1054_v30 = vsub.f32 1.0, %v1045_v17 }
0x122b   :  { %1049 = vrot.lane.b32.xlu0 %v1047_v62, %s1422_s28 }
0x129d   :  { %v1050_v43 = vpop.permute.xlu0 %1049 }
0x129e   :  { %v1052_v6 = vadd.f32 %v1050_v43, %v1023_v40 }
0x12a0   :  { %1357 = vtanh.f32 %v1052_v6 }
0x12a6   :  { %v1358_v7 = vpop.eup %1357 }
0x12a7   :  { %1056 = vrot.lane.b32.xlu2 %v1358_v7, %s1423_s29 }
0x1301   :  { %v1057_v63 = vpop.permute.xlu2 %1056 }
0x1302   :  { %v1059_v0 = vmul.f32 %v1057_v63, %v1054_v30  ;;  %v928_v30 = vmul.f32 %v1835_v12, %v1827_v27 }
0x1304   :  { %1061 = vrot.lane.b32.xlu1 %v1059_v0, %s1423_s29 }
0x1376   :  { %v1062_v48 = vpop.permute.xlu1 %1061 }
0x1377   :  { %1290 = vmatmul.msk.f32.vlgmr.msrb.gmra.mxu2 %vm147_vm2, %v1062_v48 }
0x13fa   :  { %v1082_v3 = vpop.f32.mrf.mxu2 }
0x13fb   :  { %v1083_v50 = vadd.f32 %v1082_v3, %v1516_v34 }
0x13fd   :  { %1106 = vrot.lane.b32.xlu0 %v1083_v50, %s1422_s28  ;;  %v1085_v54 = vadd.f32 %v1083_v50, %v1026_v28 }
0x13ff   :  { %v1291_v32 = vmul.f32 -1.442695, %v1085_v54 }
0x1401   :  { %1359 = vpow2.f32 %v1291_v32 }
0x1407   :  { %v1360_v58 = vpop.eup %1359 }
0x1408   :  { %v1089_v20 = vadd.f32 1.0, %v1360_v58 }
0x140a   :  { %1361 = vrcp.f32 %v1089_v20  ;;  %v1101_v49 = vand.u32 2147483648, %v1089_v20  ;;  %vm1095_vm0 = vweird.f32 %v1089_v20  ;;  %v1099_v31 = vand.u32 2147483647, %v1089_v20 }
0x140c   :  { %v1102_v34 = vor.u32 1.1754944e-38, %v1101_v49  ;;  %vm1100_vm4 = vcmp.eq.f32.partialorder %v1099_v31, 8.507059e+37 }
0x1410   :  { %v1362_v1 = vpop.eup %1361 }
0x1411   :  { %v1091_v60 = vmul.f32 %v1362_v1, %v1089_v20  ;;  %vm1096_vm15 = vweird.f32 %v1362_v1 }
0x1412   :  { %vm1097_vm1 = vmor %vm1095_vm0, %vm1096_vm15 }
0x1413   :  { %v1092_v47 = vsub.f32 1.0, %v1091_v60 }
0x1415   :  { %v1093_v8 = vmul.f32 %v1362_v1, %v1092_v47 }
0x1417   :  { %v1094_v10 = vadd.f32 %v1362_v1, %v1093_v8 }
0x1419   :  { %v1098_v51 = vsel %vm1097_vm1, %v1362_v1, %v1094_v10 }
0x141a   :  { %v1103_v35 = vsel %vm1100_vm4, %v1102_v34, %v1098_v51 }
0x141b   :  { %v1116_v57 = vsub.f32 1.0, %v1103_v35  ;;  %v1122_v37 = vmul.f32 %v1103_v35, %v1059_v0 }
0x146f   :  { %v1107_v24 = vpop.permute.xlu0 %1106 }
0x1470   :  { %v1109_v16 = vmul.f32 %v1107_v24, %v1103_v35 }
0x1472   :  { %1111 = vrot.lane.b32.xlu2 %v1109_v16, %s1422_s28 }
0x14cc   :  { %v1112_v13 = vpop.permute.xlu2 %1111 }
0x14cd   :  { %v1114_v4 = vadd.f32 %v1112_v13, %v1026_v28 }
0x14cf   :  { %1363 = vtanh.f32 %v1114_v4 }
0x14d0   :  { %1365 = vlog2.f32 %v1711_v26 }
0x14d1   :  { %1367 = vlog2.f32 %v1838_v19 }
0x14d5   :  { %v1364_v2 = vpop.eup %1363 }
0x14d6   :  { %1118 = vrot.lane.b32.xlu1 %v1364_v2, %s1423_s29 }
0x1548   :  { %v1119_v59 = vpop.permute.xlu1 %1118 }
0x1549   :  { %v1121_v38 = vmul.f32 %v1119_v59, %v1116_v57 }
0x154b   :  { %v1123_v39 = vadd.f32 %v1122_v37, %v1121_v38 }
0x154d   :  { %1125 = vrot.lane.b32.xlu0 %v1123_v39, %s1423_s29 }
0x15bf   :  { %v1126_v40 = vpop.permute.xlu0 %1125 }
0x15c0   :  { %1292 = vmatmul.msk.f32.vlgmr.msrb.gmra.mxu3 %vm147_vm2, %v1126_v40  ;;  %1293 = vmatmul.msk.f32.vlgmr.msra.gmra.mxu0 %vm147_vm2, %v1126_v40 }
0x163d   :  { %v1166_v5 = vpop.f32.mrf.mxu0 }
0x163e   :  { %v1167_v28 = vadd.f32 %v1166_v5, %v1669_v45  ;;  %v510_v45 = vmul.f32 %v1708_v25, %v1691_v21  ;;  %v925_v21 = vsel %vm472_vm12, %v924_v23, 0.0 }
0x1643   :  { %v1146_v18 = vpop.f32.mrf.mxu3 }
0x1644   :  { %v1147_v9 = vadd.f32 %v1146_v18, %v1671_v46  ;;  %v1366_v46 = vpop.eup %1365 }
0x1645   :  { %v505_v17 = vmul.f32 0.6931472, %v1366_v46  ;;  %v1368_v42 = vpop.eup %1367 }
0x1646   :  { %1294 = vmatmul.msk.f32.vlgmr.msra.gmra.mxu1 %vm147_vm2, %v1147_v9  ;;  %v1193_v29 = vmul.f32 %v1167_v28, %v1147_v9  ;;  %vm546_vm2 = vcmask 42024   ;;  %v923_v0 = vmul.f32 0.6931472, %v1368_v42 }
0x1648   :  { %v1194_v22 = vsel %vm467_vm11, %v1193_v29, 0.0  ;;  %vm960_vm11 = vcmask 50224  }
0x1649   :  { %1195 = vadd.xlane.f32.xlu2 %v1194_v22 }
0x1651   :  { %508 = vadd.xlane.f32.xlu2 %v507_v41 }
0x16bc   :  { %v1196_v55 = vpop.xlane.xlu2 %1195 }
0x16bd   :  { %v1197_v25 = vmul.f32 0.17677669, %v1196_v55 }
0x16c3   :  { %v1189_v61 = vpop.f32.mrf.mxu1 }
0x16c4   :  { %v1192_v36 = vmul.f32 0.17677669, %v1189_v61  ;;  %v509_v14 = vpop.xlane.xlu2 %508 }
0x16c5   :  { %v511_v15 = vadd.f32 %v510_v45, %v509_v14 }
0x16c6   :  { %v1198_v44 = vsel %vm472_vm12, %v1192_v36, -inf }
0x16c7   :  { %v512_v62 = vmul.f32 %v511_v15, %v1718_v53  ;;  %1199 = vmax.xlane.f32.xlu1 %v1198_v44 }
0x16c9   :  { %v513_v52 = vsub.f32 %v505_v17, %v512_v62 }
0x16cb   :  { %547 = vst.msk [vmem:[%s1918_s2] sm:$0x3] %vm546_vm2, %v513_v52 }
0x16cf   :  { %926 = vadd.xlane.f32.xlu1 %v925_v21 }
0x173a   :  { %v1200_v26 = vpop.xlane.xlu1 %1199 }
0x173b   :  { %v1201_v43 = vmax.f32 %v1200_v26, %v1197_v25 }
0x173d   :  { %v1202_v6 = vsub.f32 %v1192_v36, %v1201_v43  ;;  %v1205_v53 = vsub.f32 %v1197_v25, %v1201_v43 }
0x173f   :  { %v1203_v7 = vmul.f32 1.442695, %v1202_v6  ;;  %v1206_v19 = vmul.f32 1.442695, %v1205_v53 }
0x1741   :  { %1369 = vpow2.f32 %v1203_v7 }
0x1742   :  { %v927_v56 = vpop.xlane.xlu1 %926  ;;  %1371 = vpow2.f32 %v1206_v19 }
0x1743   :  { %v929_v63 = vadd.f32 %v928_v30, %v927_v56 }
0x1745   :  { %v930_v48 = vmul.f32 %v929_v63, %v1845_v11 }
0x1747   :  { %v1370_v3 = vpop.eup %1369  ;;  %v931_v50 = vsub.f32 %v923_v0, %v930_v48 }
0x1748   :  { %v1208_v54 = vsel %vm472_vm12, %v1370_v3, 0.0  ;;  %v1229_v27 = vmul.f32 %v1370_v3, %v1202_v6  ;;  %v1372_v11 = vpop.eup %1371 }
0x1749   :  { %961 = vst.msk [vmem:[%s1918_s2] sm:$0x3] %vm960_vm11, %v931_v50  ;;  %1209 = vadd.xlane.f32.xlu0 %v1208_v54  ;;  %v1233_v51 = vmul.f32 %v1372_v11, %v1205_v53 }
0x174a   :  { %1237 = vst.msk [vmem:[%s1918_s2] sm:$0x3] %vm472_vm12, %v1192_v36  ;;  %v1230_v12 = vsel %vm472_vm12, %v1229_v27, 0.0 }
0x174b   :  { %1239 = vst.msk [vmem:[%s1918_s2] sm:$0x3] %vm1238_vm6, %v1197_v25 }
0x1751   :  { %1231 = vadd.xlane.f32.xlu0 %v1230_v12 }
0x17bc   :  { %v1210_v32 = vpop.xlane.xlu0 %1209 }
0x17bd   :  { %v1211_v58 = vadd.f32 %v1372_v11, %v1210_v32 }
0x17bf   :  { %1373 = vrcp.f32 %v1211_v58  ;;  %v1223_v47 = vand.u32 2147483648, %v1211_v58  ;;  %v1221_v10 = vand.u32 2147483647, %v1211_v58  ;;  %vm1217_vm7 = vweird.f32 %v1211_v58 }
0x17c0   :  { %1375 = vlog2.f32 %v1211_v58 }
0x17c1   :  { %v1224_v24 = vor.u32 1.1754944e-38, %v1223_v47  ;;  %vm1222_vm8 = vcmp.eq.f32.partialorder %v1221_v10, 8.507059e+37 }
0x17c4   :  { %v1232_v49 = vpop.xlane.xlu0 %1231 }
0x17c5   :  { %v1374_v20 = vpop.eup %1373  ;;  %v1234_v16 = vadd.f32 %v1233_v51, %v1232_v49 }
0x17c6   :  { %v1213_v1 = vmul.f32 %v1374_v20, %v1211_v58  ;;  %vm1218_vm5 = vweird.f32 %v1374_v20  ;;  %v1376_v34 = vpop.eup %1375 }
0x17c7   :  { %vm1219_vm12 = vmor %vm1217_vm7, %vm1218_vm5  ;;  %v1228_v4 = vmul.f32 0.6931472, %v1376_v34 }
0x17c8   :  { %v1214_v60 = vsub.f32 1.0, %v1213_v1 }
0x17ca   :  { %v1215_v8 = vmul.f32 %v1374_v20, %v1214_v60 }
0x17cc   :  { %v1216_v31 = vadd.f32 %v1374_v20, %v1215_v8 }
0x17ce   :  { %v1220_v35 = vsel %vm1219_vm12, %v1374_v20, %v1216_v31 }
0x17cf   :  { %v1225_v13 = vsel %vm1222_vm8, %v1224_v24, %v1220_v35 }
0x17d0   :  { %v1235_v2 = vmul.f32 %v1234_v16, %v1225_v13 }
0x17d2   :  { %v1236_v57 = vsub.f32 %v1228_v4, %v1235_v2 }
0x17d4   :  { %1241 = vst.msk [vmem:[%s1918_s2] sm:$0x3] %vm1240_vm9, %v1236_v57 }
0x17d5   :  { %1246 = vsyncpa [#allocation5], 1 }

</bundles_post_ra>
